<compile_context>
chip_gen: v7x
topology: tpu7x:2x2x1
jax: 0.10.0
libtpu: 0.0.40
codegen_flags: <defaults>
</compile_context>

<pallas_src>
import math
from functools import partial

import jax
import jax.numpy as jnp
from jax.experimental import pallas as pl
from jax.experimental.pallas import tpu as pltpu


def to_2tuple(x):
    return tuple(x) if isinstance(x, (tuple, list)) else (x, x)


# ----------------------------- Pallas kernel --------------------------------

def _pa_embed_kernel(xpad_ref, w_ref, b_ref, o_ref, *, H, W, C, K):
    """Fused depthwise KxK conv + sigmoid gate.

    xpad_ref: (Bb, H+2p, (W+2p)*C)  channels-last, spatially padded, lanes fused
    w_ref:    (K, K, W*C)           depthwise weights tiled W times along lanes
    b_ref:    (1, W*C)              bias tiled W times along lanes
    o_ref:    (Bb, H, W*C)
    """
    WC = W * C
    pad = (K - 1) // 2

    xpad = xpad_ref[...]                                            # load once
    acc = jnp.broadcast_to(b_ref[0][None, None, :], o_ref.shape)
    acc = acc.astype(jnp.float32)

    # Depthwise conv as K*K shifted multiply-accumulates (pure VPU work;
    # the lane/sublane shifts from the static slices go to the XLU, which is
    # otherwise idle in this kernel).
    for dy in range(K):
        for dx in range(K):
            tap = xpad[:, dy:dy + H, dx * C: dx * C + WC]
            acc = acc + tap.astype(jnp.float32) * w_ref[dy, dx, :][None, None, :]

    x_c = xpad[:, pad:pad + H, pad * C: pad * C + WC].astype(jnp.float32)
    o_ref[...] = (x_c * jax.nn.sigmoid(acc)).astype(o_ref.dtype)


def pa_flatten_pallas(x_nchw, weight, bias, kernel_size):
    """x_nchw: (B, C, H, W) -> (B, H*W, C) == x * sigmoid(dwconv(x)), flattened."""
    B, C, H, W = x_nchw.shape
    K = kernel_size
    pad = (K - 1) // 2
    Hp, Wp = H + 2 * pad, W + 2 * pad

    # Channels-last + spatial pad, then fuse (W_pad, C) into one lane-dense axis.
    x_nhwc = jnp.transpose(x_nchw, (0, 2, 3, 1))
    xp = jnp.pad(x_nhwc, ((0, 0), (pad, pad), (pad, pad), (0, 0)))
    xp = xp.reshape(B, Hp, Wp * C)

    # torch depthwise weight (C, 1, K, K) -> (K, K, C) -> tiled W times along lane.
    w_kkc = jnp.transpose(weight.reshape(C, K, K), (1, 2, 0))       # (K, K, C)
    w_tiled = jnp.tile(w_kkc, (1, 1, W))                            # (K, K, W*C)
    b_tiled = jnp.tile(bias.reshape(1, C), (1, W))                  # (1, W*C)

    # Batch several images per grid step (target a few MiB per block) but keep
    # the grid length >= 2 when possible so both v7x TensorCores stay busy.
    bytes_per_img = (Hp * Wp * C + H * W * C) * x_nchw.dtype.itemsize
    target_bytes = 4 << 20
    bb_cap = max(1, target_bytes // max(1, bytes_per_img))
    if B >= 2:
        bb_cap = min(bb_cap, B // 2)
    Bb = 1
    for d in range(1, B + 1):          # largest divisor of B that fits the cap
        if B % d == 0 and d <= bb_cap:
            Bb = d
    grid = (B // Bb,)

    out = pl.pallas_call(
        partial(_pa_embed_kernel, H=H, W=W, C=C, K=K),
        out_shape=jax.ShapeDtypeStruct((B, H, W * C), x_nchw.dtype),
        grid_spec=pltpu.PrefetchScalarGridSpec(
            num_scalar_prefetch=0,
            grid=grid,
            in_specs=[
                pl.BlockSpec((Bb, Hp, Wp * C), lambda b: (b, 0, 0)),
                pl.BlockSpec((K, K, W * C), lambda b: (0, 0, 0)),
                pl.BlockSpec((1, W * C), lambda b: (0, 0)),
            ],
            out_specs=pl.BlockSpec((Bb, H, W * C), lambda b: (b, 0, 0)),
        ),
        compiler_params=pltpu.CompilerParams(
            dimension_semantics=("parallel",),
            vmem_limit_bytes=48 << 20,     # safe on v5e/v6e (128 MiB) and v7x (64 MiB)
        ),
    )(xp, w_tiled, b_tiled)

    # Free row-major reshape: (B, H, W*C) -> (B, H*W, C), identical to
    # x.flatten(2).transpose(1, 2) applied to the gated NCHW tensor.
    return out.reshape(B, H * W, C)


# ------------------------------ Module wrapper -------------------------------

class PatchEmbedPallas:
    def __init__(self, img_size=224, patch_size=4, in_chans=3, embed_dim=96,
                 norm_layer=None, with_pos=True, is_spa=True, key=None):
        img_size = to_2tuple(img_size)
        patch_size = to_2tuple(patch_size)
        patches_resolution = [img_size[0] // patch_size[0],
                              img_size[1] // patch_size[1]]
        self.img_size = img_size
        self.patch_size = patch_size
        self.patches_resolution = patches_resolution
        self.num_patches = patches_resolution[0] * patches_resolution[1]
        self.in_chans = in_chans
        self.embed_dim = embed_dim
        self.with_pos = with_pos
        self.kernel_size = 3 if is_spa else 5

        # Deterministic init of the PA depthwise conv (mirrors nn.Conv2d default
        # uniform(-1/sqrt(fan_in), 1/sqrt(fan_in)) with fan_in = K*K for groups=dim).
        k = jax.random.PRNGKey(1) if key is None else key
        kw, kb = jax.random.split(k)
        bound = 1.0 / math.sqrt(self.kernel_size * self.kernel_size)
        self.pa_weight = jax.random.uniform(
            kw, (embed_dim, 1, self.kernel_size, self.kernel_size),
            jnp.float32, -bound, bound)
        self.pa_bias = jax.random.uniform(kb, (embed_dim,), jnp.float32,
                                          -bound, bound)

        # TODO(synk): norm_layer (None by default in the spec) is not translated;
        # if given, a LayerNorm over the last dim would be applied after the kernel.
        self.norm = None

    def __call__(self, x):
        # x: (B, embed_dim, H, W) with (H, W) == patches_resolution
        if self.with_pos:
            return pa_flatten_pallas(x, self.pa_weight, self.pa_bias,
                                     self.kernel_size)
        B, C, H, W = x.shape
        return jnp.transpose(x.reshape(B, C, H * W), (0, 2, 1))


# ----------------------- Pure-JAX reference (no Pallas) ----------------------

def reference_forward(x, weight, bias, K):
    B, C, H, W = x.shape
    pad = (K - 1) // 2
    y = jax.lax.conv_general_dilated(
        x, weight, window_strides=(1, 1),
        padding=((pad, pad), (pad, pad)),
        dimension_numbers=("NCHW", "OIHW", "NCHW"),
        feature_group_count=C,
        precision=jax.lax.Precision.HIGHEST)
    y = y + bias.reshape(1, C, 1, 1)
    out = x * jax.nn.sigmoid(y)
    return jnp.transpose(out.reshape(B, C, H * W), (0, 2, 1))


if __name__ == "__main__":
    # Small deterministic example: img_size=64, patch_size=4 -> 16x16 patches,
    # embed_dim=32, batch=2.  PatchEmbed.forward consumes the already-embedded
    # feature map, so x has shape (B, embed_dim, H_patches, W_patches).
    B, embed_dim = 2, 32
    mod = PatchEmbedPallas(img_size=64, patch_size=4, in_chans=3,
                           embed_dim=embed_dim, norm_layer=None,
                           with_pos=True, is_spa=True)
    H, W = mod.patches_resolution

    x = jax.random.normal(jax.random.PRNGKey(0), (B, embed_dim, H, W),
                          dtype=jnp.float32)

    out = jax.block_until_ready(mod(x))
    ref = reference_forward(x, mod.pa_weight, mod.pa_bias, mod.kernel_size)

    assert out.shape == (B, H * W, embed_dim), out.shape
    err = float(jnp.max(jnp.abs(out - ref)))
    assert err < 1e-4, err

    # Also exercise the 5x5 (is_spa=False) path once.
    mod5 = PatchEmbedPallas(img_size=64, patch_size=4, in_chans=3,
                            embed_dim=embed_dim, norm_layer=None,
                            with_pos=True, is_spa=False)
    out5 = jax.block_until_ready(mod5(x))
    ref5 = reference_forward(x, mod5.pa_weight, mod5.pa_bias, mod5.kernel_size)
    err5 = float(jnp.max(jnp.abs(out5 - ref5)))
    assert err5 < 1e-4, err5

    print("KERNEL_OK")
</pallas_src>

<mosaic_0001>
module attributes {stable_mosaic.version = 11 : i64} {
  func.func @_pa_embed_kernel(%arg0: i32, %arg1: memref<1x18x576xf32, #tpu.memory_space<vmem>>, %arg2: memref<3x3x512xf32, #tpu.memory_space<vmem>>, %arg3: memref<1x512xf32, #tpu.memory_space<vmem>>, %arg4: memref<1x16x512xf32, #tpu.memory_space<vmem>>) attributes {dimension_semantics = [#tpu.dimension_semantics<parallel>], iteration_bounds = array<i64: 2>, scalar_prefetch = 0 : i64, scratch_operands = 0 : i64, tpu.core_type = #tpu.core_type<tc>, window_params = [{transform_indices = @transform_0, window_bounds = array<i64: 1, 18, 576>}, {pipeline_mode = #tpu.pipeline_mode<synchronous>, transform_indices = @transform_1, window_bounds = array<i64: 3, 3, 512>}, {pipeline_mode = #tpu.pipeline_mode<synchronous>, transform_indices = @transform_2, window_bounds = array<i64: 1, 512>}, {transform_indices = @transform_3, window_bounds = array<i64: 1, 16, 512>}]} {
    %c0 = arith.constant 0 : index
    %c0_0 = arith.constant 0 : index
    %c0_1 = arith.constant 0 : index
    %0 = vector.load %arg1[%c0, %c0_0, %c0_1] : memref<1x18x576xf32, #tpu.memory_space<vmem>>, vector<1x18x576xf32>
    %c0_2 = arith.constant 0 : index
    %c0_3 = arith.constant 0 : index
    %1 = vector.load %arg3[%c0_2, %c0_3] : memref<1x512xf32, #tpu.memory_space<vmem>>, vector<1x512xf32>
    %2 = vector.shape_cast %1 : vector<1x512xf32> to vector<512xf32>
    %3 = vector.shape_cast %2 : vector<512xf32> to vector<1x1x512xf32>
    %4 = vector.shape_cast %3 : vector<1x1x512xf32> to vector<1x1x512xf32>
    %5 = vector.broadcast %4 : vector<1x1x512xf32> to vector<1x16x512xf32>
    %6 = vector.extract_strided_slice %0 {offsets = [0, 0, 0], sizes = [1, 16, 512], strides = [1, 1, 1]} : vector<1x18x576xf32> to vector<1x16x512xf32>
    %c0_4 = arith.constant 0 : index
    %c0_5 = arith.constant 0 : index
    %c0_6 = arith.constant 0 : index
    %7 = vector.load %arg2[%c0_4, %c0_5, %c0_6] : memref<3x3x512xf32, #tpu.memory_space<vmem>>, vector<1x1x512xf32>
    %8 = vector.shape_cast %7 : vector<1x1x512xf32> to vector<512xf32>
    %9 = vector.shape_cast %8 : vector<512xf32> to vector<1x1x512xf32>
    %10 = vector.broadcast %9 : vector<1x1x512xf32> to vector<1x16x512xf32>
    %11 = arith.mulf %6, %10 : vector<1x16x512xf32>
    %12 = arith.addf %5, %11 : vector<1x16x512xf32>
    %13 = vector.extract_strided_slice %0 {offsets = [0, 0, 32], sizes = [1, 16, 512], strides = [1, 1, 1]} : vector<1x18x576xf32> to vector<1x16x512xf32>
    %c0_7 = arith.constant 0 : index
    %c1 = arith.constant 1 : index
    %c0_8 = arith.constant 0 : index
    %14 = vector.load %arg2[%c0_7, %c1, %c0_8] : memref<3x3x512xf32, #tpu.memory_space<vmem>>, vector<1x1x512xf32>
    %15 = vector.shape_cast %14 : vector<1x1x512xf32> to vector<512xf32>
    %16 = vector.shape_cast %15 : vector<512xf32> to vector<1x1x512xf32>
    %17 = vector.broadcast %16 : vector<1x1x512xf32> to vector<1x16x512xf32>
    %18 = arith.mulf %13, %17 : vector<1x16x512xf32>
    %19 = arith.addf %12, %18 : vector<1x16x512xf32>
    %20 = vector.extract_strided_slice %0 {offsets = [0, 0, 64], sizes = [1, 16, 512], strides = [1, 1, 1]} : vector<1x18x576xf32> to vector<1x16x512xf32>
    %c0_9 = arith.constant 0 : index
    %c2 = arith.constant 2 : index
    %c0_10 = arith.constant 0 : index
    %21 = vector.load %arg2[%c0_9, %c2, %c0_10] : memref<3x3x512xf32, #tpu.memory_space<vmem>>, vector<1x1x512xf32>
    %22 = vector.shape_cast %21 : vector<1x1x512xf32> to vector<512xf32>
    %23 = vector.shape_cast %22 : vector<512xf32> to vector<1x1x512xf32>
    %24 = vector.broadcast %23 : vector<1x1x512xf32> to vector<1x16x512xf32>
    %25 = arith.mulf %20, %24 : vector<1x16x512xf32>
    %26 = arith.addf %19, %25 : vector<1x16x512xf32>
    %27 = vector.extract_strided_slice %0 {offsets = [0, 1, 0], sizes = [1, 16, 512], strides = [1, 1, 1]} : vector<1x18x576xf32> to vector<1x16x512xf32>
    %c1_11 = arith.constant 1 : index
    %c0_12 = arith.constant 0 : index
    %c0_13 = arith.constant 0 : index
    %28 = vector.load %arg2[%c1_11, %c0_12, %c0_13] : memref<3x3x512xf32, #tpu.memory_space<vmem>>, vector<1x1x512xf32>
    %29 = vector.shape_cast %28 : vector<1x1x512xf32> to vector<512xf32>
    %30 = vector.shape_cast %29 : vector<512xf32> to vector<1x1x512xf32>
    %31 = vector.broadcast %30 : vector<1x1x512xf32> to vector<1x16x512xf32>
    %32 = arith.mulf %27, %31 : vector<1x16x512xf32>
    %33 = arith.addf %26, %32 : vector<1x16x512xf32>
    %34 = vector.extract_strided_slice %0 {offsets = [0, 1, 32], sizes = [1, 16, 512], strides = [1, 1, 1]} : vector<1x18x576xf32> to vector<1x16x512xf32>
    %c1_14 = arith.constant 1 : index
    %c1_15 = arith.constant 1 : index
    %c0_16 = arith.constant 0 : index
    %35 = vector.load %arg2[%c1_14, %c1_15, %c0_16] : memref<3x3x512xf32, #tpu.memory_space<vmem>>, vector<1x1x512xf32>
    %36 = vector.shape_cast %35 : vector<1x1x512xf32> to vector<512xf32>
    %37 = vector.shape_cast %36 : vector<512xf32> to vector<1x1x512xf32>
    %38 = vector.broadcast %37 : vector<1x1x512xf32> to vector<1x16x512xf32>
    %39 = arith.mulf %34, %38 : vector<1x16x512xf32>
    %40 = arith.addf %33, %39 : vector<1x16x512xf32>
    %41 = vector.extract_strided_slice %0 {offsets = [0, 1, 64], sizes = [1, 16, 512], strides = [1, 1, 1]} : vector<1x18x576xf32> to vector<1x16x512xf32>
    %c1_17 = arith.constant 1 : index
    %c2_18 = arith.constant 2 : index
    %c0_19 = arith.constant 0 : index
    %42 = vector.load %arg2[%c1_17, %c2_18, %c0_19] : memref<3x3x512xf32, #tpu.memory_space<vmem>>, vector<1x1x512xf32>
    %43 = vector.shape_cast %42 : vector<1x1x512xf32> to vector<512xf32>
    %44 = vector.shape_cast %43 : vector<512xf32> to vector<1x1x512xf32>
    %45 = vector.broadcast %44 : vector<1x1x512xf32> to vector<1x16x512xf32>
    %46 = arith.mulf %41, %45 : vector<1x16x512xf32>
    %47 = arith.addf %40, %46 : vector<1x16x512xf32>
    %48 = vector.extract_strided_slice %0 {offsets = [0, 2, 0], sizes = [1, 16, 512], strides = [1, 1, 1]} : vector<1x18x576xf32> to vector<1x16x512xf32>
    %c2_20 = arith.constant 2 : index
    %c0_21 = arith.constant 0 : index
    %c0_22 = arith.constant 0 : index
    %49 = vector.load %arg2[%c2_20, %c0_21, %c0_22] : memref<3x3x512xf32, #tpu.memory_space<vmem>>, vector<1x1x512xf32>
    %50 = vector.shape_cast %49 : vector<1x1x512xf32> to vector<512xf32>
    %51 = vector.shape_cast %50 : vector<512xf32> to vector<1x1x512xf32>
    %52 = vector.broadcast %51 : vector<1x1x512xf32> to vector<1x16x512xf32>
    %53 = arith.mulf %48, %52 : vector<1x16x512xf32>
    %54 = arith.addf %47, %53 : vector<1x16x512xf32>
    %55 = vector.extract_strided_slice %0 {offsets = [0, 2, 32], sizes = [1, 16, 512], strides = [1, 1, 1]} : vector<1x18x576xf32> to vector<1x16x512xf32>
    %c2_23 = arith.constant 2 : index
    %c1_24 = arith.constant 1 : index
    %c0_25 = arith.constant 0 : index
    %56 = vector.load %arg2[%c2_23, %c1_24, %c0_25] : memref<3x3x512xf32, #tpu.memory_space<vmem>>, vector<1x1x512xf32>
    %57 = vector.shape_cast %56 : vector<1x1x512xf32> to vector<512xf32>
    %58 = vector.shape_cast %57 : vector<512xf32> to vector<1x1x512xf32>
    %59 = vector.broadcast %58 : vector<1x1x512xf32> to vector<1x16x512xf32>
    %60 = arith.mulf %55, %59 : vector<1x16x512xf32>
    %61 = arith.addf %54, %60 : vector<1x16x512xf32>
    %62 = vector.extract_strided_slice %0 {offsets = [0, 2, 64], sizes = [1, 16, 512], strides = [1, 1, 1]} : vector<1x18x576xf32> to vector<1x16x512xf32>
    %c2_26 = arith.constant 2 : index
    %c2_27 = arith.constant 2 : index
    %c0_28 = arith.constant 0 : index
    %63 = vector.load %arg2[%c2_26, %c2_27, %c0_28] : memref<3x3x512xf32, #tpu.memory_space<vmem>>, vector<1x1x512xf32>
    %64 = vector.shape_cast %63 : vector<1x1x512xf32> to vector<512xf32>
    %65 = vector.shape_cast %64 : vector<512xf32> to vector<1x1x512xf32>
    %66 = vector.broadcast %65 : vector<1x1x512xf32> to vector<1x16x512xf32>
    %67 = arith.mulf %62, %66 : vector<1x16x512xf32>
    %68 = arith.addf %61, %67 : vector<1x16x512xf32>
    %69 = vector.extract_strided_slice %0 {offsets = [0, 1, 32], sizes = [1, 16, 512], strides = [1, 1, 1]} : vector<1x18x576xf32> to vector<1x16x512xf32>
    %70 = arith.negf %68 : vector<1x16x512xf32>
    %71 = math.exp %70 : vector<1x16x512xf32>
    %cst = arith.constant 1.000000e+00 : f32
    %72 = vector.broadcast %cst : f32 to vector<1x16x512xf32>
    %73 = arith.addf %72, %71 : vector<1x16x512xf32>
    %74 = arith.divf %72, %73 : vector<1x16x512xf32>
    %75 = arith.mulf %69, %74 : vector<1x16x512xf32>
    %c0_29 = arith.constant 0 : index
    %c0_30 = arith.constant 0 : index
    %c0_31 = arith.constant 0 : index
    %76 = vector.load %arg4[%c0_29, %c0_30, %c0_31] : memref<1x16x512xf32, #tpu.memory_space<vmem>>, vector<1x16x512xf32>
    tpu.vector_store %arg4[%c0_29, %c0_30, %c0_31], %75 {strides = array<i32>} : memref<1x16x512xf32, #tpu.memory_space<vmem>>, vector<1x16x512xf32>,
    return
  }
  func.func @transform_0(%arg0: i32) -> (i32, i32, i32) {
    %c0_i32 = arith.constant 0 : i32
    %c0_i32_0 = arith.constant 0 : i32
    %c0_i32_1 = arith.constant 0 : i32
    return %arg0, %c0_i32, %c0_i32_0 : i32, i32, i32
  }
  func.func @transform_1(%arg0: i32) -> (i32, i32, i32) {
    %c0_i32 = arith.constant 0 : i32
    %c0_i32_0 = arith.constant 0 : i32
    %c0_i32_1 = arith.constant 0 : i32
    %c0_i32_2 = arith.constant 0 : i32
    return %c0_i32, %c0_i32_0, %c0_i32_1 : i32, i32, i32
  }
  func.func @transform_2(%arg0: i32) -> (i32, i32) {
    %c0_i32 = arith.constant 0 : i32
    %c0_i32_0 = arith.constant 0 : i32
    %c0_i32_1 = arith.constant 0 : i32
    return %c0_i32, %c0_i32_0 : i32, i32
  }
  func.func @transform_3(%arg0: i32) -> (i32, i32, i32) {
    %c0_i32 = arith.constant 0 : i32
    %c0_i32_0 = arith.constant 0 : i32
    %c0_i32_1 = arith.constant 0 : i32
    return %arg0, %c0_i32, %c0_i32_0 : i32, i32, i32
  }
}

</mosaic_0001>

<bundles_post_ra>
// kernel: tpu_custom_call.1
= control target key start
LH: loop header
LB: loop body
LE: loop exit
PB: predicated region body
PF: predicated region fallthrough
CT: control target
= control target key end

     0   :  { %8 = vsyncpa [#allocation3], 0  ;;  %s2388_s0 = inlined_call_operand.vmem [shape: f32[2,18,576], index: 0, kind: input, shape index: {}]   ;;  %s2389_s1 = inlined_call_operand.vmem [shape: f32[3,3,512], index: 1, kind: input, shape index: {}]   ;;  %s2390_s2 = inlined_call_operand.vmem [shape: f32[1,512], index: 2, kind: input, shape index: {}]   ;;  %s2391_s3 = inlined_call_operand.hbm [shape: f32[2,16,512], index: 3, kind: output, shape index: {}]  }
   0x1   :  { %10 = vsyncpa [#allocation3 + $0x1], 0  ;;  %s1653_s12 = smov 0   ;;  %s1655_s13 = smov 0  }
   0x2   :  { %s1657_s14 = smov 0   ;;  %s1659_s15 = smov 0  }
   0x3 LB: > { %s1674_s16 = sadd.s32 4294967295, %s1626_s15   ;;  %s1445_s17 = sadd.s32 4294967294, %s1626_s15   ;;  %s1626_s15 = sphi %s1659_s15, %s2397_s15   ;;  %s1622_s14 = sphi %s1657_s14, %s2396_s14   ;;  %s1618_s13 = sphi %s1655_s13, %s2395_s13   ;;  %s1614_s12 = sphi %s1653_s12, %s2394_s12  }
   0x4   : > { %s1678_s18 = sadd.s32 1, %s1626_s15   ;;  %s91_s19 = sadd.s32 1, %s1622_s14 }
   0x5   : > { %s88_s20 = ssub.s32 %s1626_s15, %s1678_s18  ;;  %p101_p0 = scmp.ne.s32.totalorder %s1622_s14, %s1618_s13 }
   0x6   : > { %p89_p1 = scmp.eq.s32.totalorder %s88_s20, 0  ;;  %p102_p2 = scmp.eq.s32.totalorder %s1674_s16, 1 }
   0x7   : > { %p107_p3 = scmp.ne.s32.totalorder %s1618_s13, %s1614_s12  ;;  %p108_p4 = scmp.eq.s32.totalorder %s1445_s17, 1 }
   0x8   : > { %s1689_s21 = scalar_select %p89_p1, %s1622_s14, %s91_s19  }
   0x9   : > { %p1691_p5 = por %p102_p2, %p101_p0  ;;  %p1695_p6 = por %p108_p4, %p107_p3 }
   0xa   : > { %p1448_p7 = scmp.ge.s32.totalorder %s1626_s15, 1  ;;  %p140_p8 = scmp.lt.s32.totalorder %s1626_s15, 3 }
   0xc   : > { %p141_p9 = pnand %p1448_p7, %p140_p8 }
   0xd   : > { %v186_v0 = vlaneseq (!%p141_p9)  ;;  %v1451_v2 = vld [vmem:[%s2389_s1 + $0x1] ss:$4 sm:$0xf] (!%p141_p9)  ;;  %s1628_s26 = smov (!%p141_p9), 32   ;;  %s1629_s29 = smov (!%p141_p9), 64   ;;  %vm271_vm0 = vcmask (!%p141_p9), 261120  }
   0xe   : > { %144 = sbr.rel (%p141_p9) target bundleno = 669 (0x29d), region = 32  ;;  %v1452_v11 = vld [vmem:[%s2389_s1 + $0x2] ss:$4 sm:$0xf] (!%p141_p9)  ;;  %p164_p10 = scmp.lt.s32.totalorder (!%p141_p9), %s1674_s16, 1  ;;  %vm372_vm1 = vcmask (!%p141_p9), 523264  }
   0xf   : > { %v187_v1 = vshrl.u32 (!%p141_p9), %v186_v0, 7  ;;  %v1454_v16 = vld [vmem:[%s2389_s1 + $0x11] ss:$4 sm:$0xf] (!%p141_p9)  ;;  %s1630_s25 = smov (!%p141_p9), 96   ;;  %vm492_vm2 = vcmask (!%p141_p9), 1046528  }
  0x10   : > { %v1455_v21 = vld [vmem:[%s2389_s1 + $0x12] ss:$4 sm:$0xf] (!%p141_p9)  ;;  %v1457_v26 = vld [vmem:[%s2389_s1 + $0x21] ss:$4 sm:$0xf] (!%p141_p9) }
  0x11   : > { %v1704_v3 = vsub.s32 (!%p141_p9), 2, %v187_v1  ;;  %v1706_v4 = vsub.s32 (!%p141_p9), 0, %v187_v1  ;;  %v1708_v5 = vsub.s32 (!%p141_p9), 3, %v187_v1  ;;  %v1710_v6 = vsub.s32 (!%p141_p9), 1, %v187_v1  ;;  %s161_s8 = sand.u32 (!%p141_p9), 1, %s1618_s13   ;;  %s1631_s27 = smov (!%p141_p9), [#allocation2]  }
  0x12   : > { %v1458_v31 = vld [vmem:[%s2389_s1 + $0x22] ss:$4 sm:$0xf] (!%p141_p9)  ;;  %vm844_vm3 = vcmask (!%p141_p9), 1045504   ;;  %vm320_vm4 = vcmask (!%p141_p9), 785408   ;;  %vm1205_vm5 = vcmask (!%p141_p9), 1040384  }
  0x13   : > { %v258_v7 = vrot.slane (!%p141_p9), %v1451_v2, %v1704_v3  ;;  %v250_v8 = vrot.slane (!%p141_p9), %v1451_v2, %v1706_v4  ;;  %v262_v9 = vrot.slane (!%p141_p9), %v1451_v2, %v1708_v5  ;;  %v254_v10 = vrot.slane (!%p141_p9), %v1451_v2, %v1710_v6  ;;  %s1449_s9 = sshll.u32 (!%p141_p9), %s161_s8, 6  ;;  %s1568_s28 = sshll.u32 (!%p141_p9), %s1631_s27, 4  ;;  %s1569_s28 = int_to_ptr.vmem [resolvable:$false] %s1568_s28 }
  0x14   : > { %v355_v12 = vrot.slane (!%p141_p9), %v1452_v11, %v1710_v6  ;;  %v351_v13 = vrot.slane (!%p141_p9), %v1452_v11, %v1706_v4  ;;  %v363_v14 = vrot.slane (!%p141_p9), %v1452_v11, %v1708_v5  ;;  %v359_v15 = vrot.slane (!%p141_p9), %v1452_v11, %v1704_v3  ;;  %s163_s10 = scalar_lea.vmem (!%p141_p9), [#allocation2], %s1449_s9  ;;  %s1570_s30 = scalar_lea.vmem (!%p141_p9), %s1569_s28, 2048 }
  0x15   : > { %267 = vrot.lane.b32.xlu1 %v258_v7, %s1628_s26  ;;  %263 = vrot.lane.b32.xlu0 %v250_v8, %s1628_s26  ;;  %v535_v17 = vrot.slane %v1454_v16, %v1706_v4  ;;  %v539_v18 = vrot.slane %v1454_v16, %v1710_v6  ;;  %v543_v19 = vrot.slane %v1454_v16, %v1704_v3  ;;  %s165_s11 = scalar_select %p164_p10, %s1674_s16, 1 }
  0x16   : > { %v547_v20 = vrot.slane %v1454_v16, %v1708_v5  ;;  %v669_v22 = vrot.slane %v1455_v21, %v1706_v4  ;;  %v673_v23 = vrot.slane %v1455_v21, %v1710_v6  ;;  %v677_v24 = vrot.slane %v1455_v21, %v1704_v3 }
  0x17   : > { %v681_v25 = vrot.slane %v1455_v21, %v1708_v5  ;;  %v891_v27 = vrot.slane %v1457_v26, %v1710_v6  ;;  %v887_v28 = vrot.slane %v1457_v26, %v1706_v4  ;;  %v895_v29 = vrot.slane %v1457_v26, %v1704_v3  ;;  %s1473_s17 = smul.u32 120, %s165_s11  ;;  %s1472_s11 = sshll.u32 %s1674_s16, 10 }
  0x18   : > { %v899_v30 = vrot.slane %v1457_v26, %v1708_v5  ;;  %v1021_v32 = vrot.slane %v1458_v31, %v1706_v4  ;;  %v1025_v33 = vrot.slane %v1458_v31, %v1710_v6  ;;  %v1029_v34 = vrot.slane %v1458_v31, %v1704_v3  ;;  %s2346_s16 = scalar_lea.sflag [#allocation3], %s161_s8 }
  0x19   : > { %269 = vrot.lane.b32.xlu1 %v262_v9, %s1628_s26  ;;  %265 = vrot.lane.b32.xlu0 %v254_v10, %s1628_s26  ;;  %v1033_v35 = vrot.slane %v1458_v31, %v1708_v5  ;;  %s1780_s24 = scalar_lea.vmem %s2388_s0, %s1473_s17  ;;  %s1379_s17 = sshll.u32 %s163_s10, 4  ;;  %s2340_s17 = int_to_ptr.vmem [resolvable:$true] %s1379_s17 }
  0x1a   : > { %v1783_v36 = vld [vmem:[%s1780_s24 + $0x28] sm:$0xff]  ;;  %v1786_v37 = vld [vmem:[%s1780_s24] sm:$0xff]  ;;  %v1814_v58 = vld [vmem:[%s1780_s24 + $0x10] sm:$0xff]  ;;  %p1571_p0 = scmp.lt.s32.totalorder %s2340_s17, %s1569_s28 }
  0x1b   : > { %v1791_v42 = vld [vmem:[%s1780_s24 + $0x48] sm:$0xff]  ;;  %v1794_v43 = vld [vmem:[%s1780_s24 + $0x20] sm:$0xff]  ;;  %v1821_v61 = vld [vmem:[%s1780_s24 + $0x18] sm:$0xff] }
  0x1c   : > { %v1811_v57 = vld [vmem:[%s1780_s24 + $0x8] sm:$0xff]  ;;  %v1825_v63 = vld [vmem:[%s1780_s24 + $0x30] sm:$0xff]  ;;  %v1832_v7 = vld [vmem:[%s1780_s24 + $0x38] sm:$0xff] }
  0x1d   : > { %366 = vrot.lane.b32.xlu1 %v355_v12, %s1629_s29  ;;  %364 = vrot.lane.b32.xlu0 %v351_v13, %s1629_s29  ;;  %v1835_v8 = vld [vmem:[%s1780_s24 + $0x40] sm:$0xff]  ;;  %v1863_v26 = vld [vmem:[%s1780_s24 + $0x70] sm:$0x3] }
  0x21   : > { %370 = vrot.lane.b32.xlu1 %v363_v14, %s1629_s29  ;;  %368 = vrot.lane.b32.xlu0 %v359_v15, %s1629_s29  ;;  %v1848_v15 = vld [vmem:[%s1780_s24 + $0x50] sm:$0x3] }
  0x25   : > { %548 = vrot.lane.b32.xlu0 %v535_v17, %s1628_s26  ;;  %550 = vrot.lane.b32.xlu1 %v539_v18, %s1628_s26 }
  0x29   : > { %552 = vrot.lane.b32.xlu0 %v543_v19, %s1628_s26  ;;  %554 = vrot.lane.b32.xlu1 %v547_v20, %s1628_s26 }
  0x2d   : > { %682 = vrot.lane.b32.xlu0 %v669_v22, %s1629_s29  ;;  %684 = vrot.lane.b32.xlu1 %v673_v23, %s1629_s29 }
  0x31   : > { %686 = vrot.lane.b32.xlu0 %v677_v24, %s1629_s29  ;;  %688 = vrot.lane.b32.xlu1 %v681_v25, %s1629_s29 }
  0x35   : > { %902 = vrot.lane.b32.xlu1 %v891_v27, %s1628_s26  ;;  %900 = vrot.lane.b32.xlu0 %v887_v28, %s1628_s26 }
  0x39   : > { %904 = vrot.lane.b32.xlu0 %v895_v29, %s1628_s26  ;;  %906 = vrot.lane.b32.xlu1 %v899_v30, %s1628_s26 }
  0x3d   : > { %1034 = vrot.lane.b32.xlu0 %v1021_v32, %s1629_s29  ;;  %1036 = vrot.lane.b32.xlu1 %v1025_v33, %s1629_s29 }
  0x41   : > { %1038 = vrot.lane.b32.xlu0 %v1029_v34, %s1629_s29  ;;  %1040 = vrot.lane.b32.xlu1 %v1033_v35, %s1629_s29 }
  0x87   : > { %v268_v38 = vpop.permute.xlu1 %267  ;;  %v264_v39 = vpop.permute.xlu0 %263 }
  0x88   : > { %v285_v40 = vmul.f32 %v264_v39, %v1783_v36  ;;  %v280_v41 = vmul.f32 %v264_v39, %v1786_v37 }
  0x8a   : > { %310 = vrot.lane.b32.xlu1 %v285_v40, %s1630_s25  ;;  %300 = vrot.lane.b32.xlu0 %v280_v41, %s1630_s25 }
  0x8b   : > { %v270_v44 = vpop.permute.xlu1 %269  ;;  %v266_v45 = vpop.permute.xlu0 %265 }
  0x8c   : > { %v289_v46 = vmul.f32 %v270_v44, %v1791_v42  ;;  %v284_v47 = vmul.f32 %v270_v44, %v1794_v43  ;;  %v272_v55 = vsel %vm271_vm0, %v264_v39, %v266_v45  ;;  %v273_v56 = vsel %vm271_vm0, %v266_v45, %v268_v38 }
  0x8d   : > { %v281_v59 = vmul.f32 %v272_v55, %v1811_v57  ;;  %v282_v60 = vmul.f32 %v273_v56, %v1814_v58  ;;  %v274_v62 = vsel %vm271_vm0, %v268_v38, %v270_v44  ;;  %v286_v2 = vmul.f32 %v272_v55, %v1825_v63 }
  0x8e   : > { %318 = vrot.lane.b32.xlu1 %v289_v46, %s1630_s25  ;;  %308 = vrot.lane.b32.xlu0 %v284_v47, %s1630_s25  ;;  %v283_v1 = vmul.f32 %v274_v62, %v1821_v61  ;;  %v287_v11 = vmul.f32 %v273_v56, %v1832_v7  ;;  %v288_v12 = vmul.f32 %v274_v62, %v1835_v8 }
  0x8f   : > { %v367_v48 = vpop.permute.xlu1 %366  ;;  %v365_v49 = vpop.permute.xlu0 %364 }
  0x90   : > { %v386_v50 = vmul.f32 %v365_v49, %v1783_v36  ;;  %v381_v51 = vmul.f32 %v365_v49, %v1786_v37  ;;  %v373_v14 = vsel %vm372_vm1, %v365_v49, %v367_v48 }
  0x91   : > { %v382_v17 = vmul.f32 %v373_v14, %v1811_v57  ;;  %v387_v25 = vmul.f32 %v373_v14, %v1825_v63 }
  0x92   : > { %411 = vrot.lane.b32.xlu1 %v386_v50, %s1629_s29  ;;  %401 = vrot.lane.b32.xlu0 %v381_v51, %s1629_s29 }
  0x93   : > { %v371_v52 = vpop.permute.xlu1 %370  ;;  %v369_v0 = vpop.permute.xlu0 %368 }
  0x94   : > { %v390_v53 = vmul.f32 %v371_v52, %v1791_v42  ;;  %v385_v54 = vmul.f32 %v371_v52, %v1794_v43  ;;  %v374_v13 = vsel %vm372_vm1, %v367_v48, %v369_v0  ;;  %v375_v20 = vsel %vm372_vm1, %v369_v0, %v371_v52 }
  0x95   : > { %v383_v18 = vmul.f32 %v374_v13, %v1814_v58  ;;  %v384_v24 = vmul.f32 %v375_v20, %v1821_v61  ;;  %v388_v35 = vmul.f32 %v374_v13, %v1832_v7  ;;  %v389_v38 = vmul.f32 %v375_v20, %v1835_v8 }
  0x96   : > { %419 = vrot.lane.b32.xlu1 %v390_v53, %s1629_s29  ;;  %409 = vrot.lane.b32.xlu0 %v385_v54, %s1629_s29 }
  0x97   : > { %v1837_v9 = vpop.permute.xlu1 %550  ;;  %v549_v10 = vpop.permute.xlu0 %548 }
  0x98   : > { %v569_v21 = vmul.f32 %v549_v10, %v1783_v36  ;;  %v574_v22 = vmul.f32 %v549_v10, %v1848_v15  ;;  %v564_v23 = vmul.f32 %v549_v10, %v1786_v37  ;;  %v556_v0 = vsel %vm271_vm0, %v549_v10, %v1837_v9 }
  0x99   : > { %v565_v10 = vmul.f32 %v556_v0, %v1811_v57 }
  0x9a   : > { %302 = vrot.lane.b32.xlu1 %v281_v59, %s1630_s25  ;;  %304 = vrot.lane.b32.xlu0 %v282_v60, %s1630_s25  ;;  %v595_v27 = vrot.slane %v569_v21, 1  ;;  %v609_v28 = vrot.slane %v574_v22, 1  ;;  %v594_v34 = vrot.slane %v564_v23, 1 }
  0x9b   : > { %v1850_v16 = vpop.permute.xlu1 %554  ;;  %v553_v19 = vpop.permute.xlu0 %552 }
  0x9c   : > { %v568_v31 = vmul.f32 %v1850_v16, %v1794_v43  ;;  %v573_v32 = vmul.f32 %v1850_v16, %v1791_v42  ;;  %v578_v33 = vmul.f32 %v1850_v16, %v1863_v26  ;;  %v610_v39 = vsel %vm492_vm2, %v595_v27, %v609_v28 }
  0x9d   : > { %v596_v45 = vsel %vm492_vm2, %v594_v34, %v595_v27  ;;  %v557_v20 = vsel %vm271_vm0, %v1837_v9, %v553_v19  ;;  %v558_v21 = vsel %vm271_vm0, %v553_v19, %v1850_v16  ;;  %v597_v27 = vrot.slane %v565_v10, 1 }
  0x9e   : > { %306 = vrot.lane.b32.xlu1 %v283_v1, %s1630_s25  ;;  %312 = vrot.lane.b32.xlu0 %v286_v2, %s1630_s25  ;;  %v607_v46 = vrot.slane %v573_v32, 1  ;;  %v617_v47 = vrot.slane %v578_v33, 1  ;;  %v606_v48 = vrot.slane %v568_v31, 1  ;;  %v566_v28 = vmul.f32 %v557_v20, %v1814_v58  ;;  %v1930_v31 = vld [vmem:[%s1780_s24 + $0x58] sm:$0x3] }
  0x9f   : > { %v1865_v29 = vpop.permute.xlu1 %684  ;;  %v1869_v30 = vpop.permute.xlu0 %682  ;;  %v1933_v32 = vld [vmem:[%s1780_s24 + $0x60] sm:$0x3]  ;;  %v571_v16 = vmul.f32 %v557_v20, %v1832_v7  ;;  %v567_v19 = vmul.f32 %v558_v21, %v1821_v61  ;;  %v572_v33 = vmul.f32 %v558_v21, %v1835_v8 }
  0xa0   : > { %v698_v40 = vmul.f32 %v1869_v30, %v1786_v37  ;;  %v703_v41 = vmul.f32 %v1869_v30, %v1783_v36  ;;  %v708_v44 = vmul.f32 %v1869_v30, %v1848_v15  ;;  %v618_v55 = vsel %vm492_vm2, %v607_v46, %v617_v47  ;;  %v1952_v47 = vld [vmem:[%s1780_s24 + $0x68] sm:$0x3] }
  0xa1   : > { %v608_v56 = vsel %vm492_vm2, %v606_v48, %v607_v46  ;;  %v604_v46 = vrot.slane %v572_v33, 1 }
  0xa2   : > { %314 = vrot.lane.b32.xlu1 %v287_v11, %s1630_s25  ;;  %316 = vrot.lane.b32.xlu0 %v288_v12, %s1630_s25  ;;  %v729_v52 = vrot.slane %v703_v41, 1  ;;  %v743_v53 = vrot.slane %v708_v44, 1  ;;  %v728_v54 = vrot.slane %v698_v40, 1  ;;  %v690_v40 = vsel %vm372_vm1, %v1869_v30, %v1865_v29 }
  0xa3   : > { %v1889_v49 = vpop.permute.xlu1 %688  ;;  %v1891_v50 = vpop.permute.xlu0 %686  ;;  %v601_v41 = vrot.slane %v571_v16, 1  ;;  %v699_v48 = vmul.f32 %v690_v40, %v1811_v57 }
  0xa4   : > { %v707_v51 = vmul.f32 %v1889_v49, %v1791_v42  ;;  %v702_v59 = vmul.f32 %v1889_v49, %v1794_v43  ;;  %v712_v60 = vmul.f32 %v1889_v49, %v1863_v26  ;;  %v744_v1 = vsel %vm492_vm2, %v729_v52, %v743_v53 }
  0xa5   : > { %v730_v2 = vsel %vm492_vm2, %v728_v54, %v729_v52  ;;  %v704_v53 = vmul.f32 %v690_v40, %v1825_v63  ;;  %v691_v30 = vsel %vm372_vm1, %v1865_v29, %v1891_v50 }
  0xa6   : > { %403 = vrot.lane.b32.xlu1 %v382_v17, %s1629_s29  ;;  %405 = vrot.lane.b32.xlu0 %v383_v18, %s1629_s29  ;;  %v741_v11 = vrot.slane %v707_v51, 1  ;;  %v751_v14 = vrot.slane %v712_v60, 1  ;;  %v740_v17 = vrot.slane %v702_v59, 1  ;;  %v570_v18 = vmul.f32 %v556_v0, %v1825_v63 }
  0xa7   : > { %v1903_v62 = vpop.permute.xlu0 %900  ;;  %v692_v59 = vsel %vm372_vm1, %v1891_v50, %v1889_v49  ;;  %v731_v60 = vrot.slane %v699_v48, 1  ;;  %v705_v29 = vmul.f32 %v691_v30, %v1832_v7  ;;  %v709_v50 = vmul.f32 %v690_v40, %v1930_v31 }
  0xa8   : > { %v916_v12 = vmul.f32 %v1903_v62, %v1786_v37  ;;  %v1915_v13 = vmul.f32 %v1903_v62, %v1783_v36  ;;  %v752_v22 = vsel %vm492_vm2, %v741_v11, %v751_v14  ;;  %v742_v23 = vsel %vm492_vm2, %v740_v17, %v741_v11  ;;  %v903_v11 = vpop.permute.xlu1 %902 }
  0xa9   : > { %v598_v9 = vrot.slane %v570_v18, 1  ;;  %v701_v17 = vmul.f32 %v692_v59, %v1821_v61  ;;  %v706_v49 = vmul.f32 %v692_v59, %v1835_v8  ;;  %v710_v10 = vmul.f32 %v691_v30, %v1933_v32 }
  0xaa   : > { %407 = vrot.lane.b32.xlu1 %v384_v24, %s1629_s29  ;;  %413 = vrot.lane.b32.xlu0 %v387_v25, %s1629_s29  ;;  %v946_v24 = vrot.slane %v916_v12, 2  ;;  %v947_v25 = vrot.slane %v1915_v13, 2  ;;  %v745_v16 = vrot.slane %v709_v50, 1 }
  0xab   : > { %v599_v44 = vsel %vm492_vm2, %v597_v27, %v598_v9  ;;  %v905_v27 = vpop.permute.xlu0 %904 }
  0xac   : > { %v948_v34 = vsel %vm844_vm3, %v946_v24, %v947_v25  ;;  %v738_v24 = vrot.slane %v706_v49, 1 }
  0xae   : > { %415 = vrot.lane.b32.xlu1 %v388_v35, %s1629_s29  ;;  %417 = vrot.lane.b32.xlu0 %v389_v38, %s1629_s29  ;;  %v575_v35 = vmul.f32 %v556_v0, %v1930_v31  ;;  %v576_v38 = vmul.f32 %v557_v20, %v1933_v32  ;;  %v732_v0 = vrot.slane %v704_v53, 1  ;;  %v735_v20 = vrot.slane %v705_v29, 1 }
  0xb0   : > { %v611_v51 = vrot.slane %v575_v35, 1  ;;  %v613_v52 = vrot.slane %v576_v38, 1 }
  0xb2   : > { %629 = vrot.lane.b32.xlu1 %v610_v39, %s1630_s25  ;;  %619 = vrot.lane.b32.xlu0 %v596_v45, %s1630_s25  ;;  %v600_v39 = vrot.slane %v566_v28, 1  ;;  %v603_v45 = vrot.slane %v567_v19, 1  ;;  %v612_v12 = vsel %vm492_vm2, %v598_v9, %v611_v51  ;;  %v907_v28 = vpop.permute.xlu1 %906  ;;  %v908_v9 = vsel %vm271_vm0, %v1903_v62, %v903_v11 }
  0xb3   : > { %v747_v19 = vrot.slane %v710_v10, 1  ;;  %v910_v35 = vsel %vm271_vm0, %v905_v27, %v907_v28  ;;  %v922_v40 = vmul.f32 %v908_v9, %v1825_v63 }
  0xb4   : > { %v605_v54 = vsel %vm492_vm2, %v603_v45, %v604_v46  ;;  %v1994_v45 = vmul.f32 %v910_v35, %v1835_v8 }
  0xb5   : > { %v748_v51 = vsel %vm492_vm2, %v735_v20, %v747_v19  ;;  %v929_v19 = vmul.f32 %v910_v35, %v1952_v47 }
  0xb6   : > { %637 = vrot.lane.b32.xlu1 %v618_v55, %s1630_s25  ;;  %627 = vrot.lane.b32.xlu0 %v608_v56, %s1630_s25  ;;  %v602_v55 = vsel %vm492_vm2, %v600_v39, %v601_v41  ;;  %v577_v56 = vmul.f32 %v558_v21, %v1952_v47  ;;  %v733_v21 = vsel %vm492_vm2, %v731_v60, %v732_v0 }
  0xb7   : > { %v917_v39 = vmul.f32 %v908_v9, %v1811_v57 }
  0xb8   : > { %v615_v14 = vrot.slane %v577_v56, 1  ;;  %v956_v56 = vrot.slane %v1994_v45, 2 }
  0xb9   : > { %v949_v53 = vrot.slane %v917_v39, 2 }
  0xba   : > { %763 = vrot.lane.b32.xlu1 %v744_v1, %s1629_s29  ;;  %753 = vrot.lane.b32.xlu0 %v730_v2, %s1629_s29  ;;  %v700_v1 = vmul.f32 %v691_v30, %v1814_v58  ;;  %v614_v2 = vsel %vm492_vm2, %v601_v41, %v613_v52  ;;  %v711_v41 = vmul.f32 %v692_v59, %v1952_v47  ;;  %v950_v30 = vrot.slane %v922_v40, 2 }
  0xbb   : > { %v746_v52 = vsel %vm492_vm2, %v732_v0, %v745_v16  ;;  %v926_v59 = vmul.f32 %v1903_v62, %v1848_v15 }
  0xbc   : > { %v734_v18 = vrot.slane %v700_v1, 1  ;;  %v920_v1 = vmul.f32 %v907_v28, %v1794_v43  ;;  %v951_v0 = vsel %vm844_vm3, %v949_v53, %v950_v30 }
  0xbd   : > { %v961_v62 = vrot.slane %v926_v59, 2 }
  0xbe   : > { %771 = vrot.lane.b32.xlu1 %v752_v22, %s1629_s29  ;;  %761 = vrot.lane.b32.xlu0 %v742_v23, %s1629_s29  ;;  %v616_v22 = vsel %vm492_vm2, %v604_v46, %v615_v14  ;;  %v737_v23 = vrot.slane %v701_v17, 1  ;;  %v736_v33 = vsel %vm492_vm2, %v734_v18, %v735_v20  ;;  %v1037_v14 = vpop.permute.xlu1 %1036  ;;  %v958_v50 = vrot.slane %v920_v1, 2  ;;  %v1035_v18 = vpop.permute.xlu0 %1034 }
  0xbf   : > { %v927_v20 = vmul.f32 %v908_v9, %v1930_v31  ;;  %v1055_v13 = vmul.f32 %v1035_v18, %v1783_v36 }
  0xc0   : > { %v739_v38 = vsel %vm492_vm2, %v737_v23, %v738_v24  ;;  %v930_v23 = vmul.f32 %v907_v28, %v1863_v26 }
  0xc1   : > { %v963_v16 = vrot.slane %v927_v20, 2 }
  0xc2   : > { %621 = vrot.lane.b32.xlu1 %v599_v44, %s1630_s25  ;;  %971 = vrot.lane.b32.xlu0 %v948_v34, %s1630_s25  ;;  %v909_v34 = vsel %vm271_vm0, %v903_v11, %v905_v27  ;;  %v919_v44 = vmul.f32 %v910_v35, %v1821_v61  ;;  %v969_v40 = vrot.slane %v930_v23, 2 }
  0xc3   : > { %v918_v46 = vmul.f32 %v909_v34, %v1814_v58  ;;  %v923_v48 = vmul.f32 %v909_v34, %v1832_v7  ;;  %v928_v17 = vmul.f32 %v909_v34, %v1933_v32  ;;  %v964_v35 = vsel %vm844_vm3, %v950_v30, %v963_v16 }
  0xc5   : > { %v952_v60 = vrot.slane %v918_v46, 2  ;;  %v953_v29 = vrot.slane %v923_v48, 2 }
  0xc6   : > { %625 = vrot.lane.b32.xlu1 %v605_v54, %s1630_s25  ;;  %623 = vrot.lane.b32.xlu0 %v602_v55, %s1630_s25  ;;  %v749_v54 = vrot.slane %v711_v41, 1  ;;  %v955_v55 = vrot.slane %v919_v44, 2  ;;  %v967_v41 = vrot.slane %v929_v19, 2 }
  0xc7   : > { %v954_v49 = vsel %vm844_vm3, %v952_v60, %v953_v29 }
  0xc8   : > { %v750_v11 = vsel %vm492_vm2, %v738_v24, %v749_v54  ;;  %v962_v24 = vsel %vm844_vm3, %v947_v25, %v961_v62  ;;  %v968_v59 = vsel %vm844_vm3, %v956_v56, %v967_v41  ;;  %v206_v41 = vld [vmem:[%s2389_s1] ss:$4 sm:$0xf] }
  0xca   : > { %633 = vrot.lane.b32.xlu1 %v614_v2, %s1630_s25  ;;  %631 = vrot.lane.b32.xlu0 %v612_v12, %s1630_s25  ;;  %v925_v2 = vmul.f32 %v907_v28, %v1791_v42  ;;  %v957_v12 = vsel %vm844_vm3, %v955_v55, %v956_v56  ;;  %v1050_v28 = vmul.f32 %v1035_v18, %v1786_v37 }
  0xcc   : > { %v959_v10 = vrot.slane %v925_v2, 2  ;;  %v1080_v48 = vrot.slane %v1050_v28, 2 }
  0xce   : > { %755 = vrot.lane.b32.xlu1 %v733_v21, %s1629_s29  ;;  %635 = vrot.lane.b32.xlu0 %v616_v22, %s1630_s25  ;;  %v1042_v21 = vsel %vm372_vm1, %v1035_v18, %v1037_v14  ;;  %v965_v22 = vrot.slane %v928_v17, 2  ;;  %v960_v27 = vsel %vm844_vm3, %v958_v50, %v959_v10  ;;  %v970_v55 = vsel %vm844_vm3, %v959_v10, %v969_v40 }
  0xcf   : > { %v1051_v9 = vmul.f32 %v1042_v21, %v1811_v57  ;;  %v1056_v34 = vmul.f32 %v1042_v21, %v1825_v63  ;;  %v1061_v62 = vmul.f32 %v1042_v21, %v1930_v31 }
  0xd0   : > { %v966_v39 = vsel %vm844_vm3, %v953_v29, %v965_v22 }
  0xd1   : > { %v1083_v44 = vrot.slane %v1051_v9, 2  ;;  %v1084_v45 = vrot.slane %v1056_v34, 2 }
  0xd2   : > { %759 = vrot.lane.b32.xlu1 %v739_v38, %s1629_s29  ;;  %757 = vrot.lane.b32.xlu0 %v736_v33, %s1629_s29  ;;  %v1041_v33 = vpop.permute.xlu1 %1040  ;;  %v1039_v38 = vpop.permute.xlu0 %1038 }
  0xd3   : > { %v1044_v25 = vsel %vm372_vm1, %v1039_v38, %v1041_v33  ;;  %v1043_v46 = vsel %vm372_vm1, %v1037_v14, %v1039_v38  ;;  %v1085_v60 = vsel %vm844_vm3, %v1083_v44, %v1084_v45  ;;  %v1054_v14 = vmul.f32 %v1041_v33, %v1794_v43 }
  0xd4   : > { %v1058_v53 = vmul.f32 %v1044_v25, %v1835_v8  ;;  %v1052_v54 = vmul.f32 %v1043_v46, %v1814_v58  ;;  %v1057_v30 = vmul.f32 %v1043_v46, %v1832_v7  ;;  %v1059_v17 = vmul.f32 %v1041_v33, %v1791_v42 }
  0xd5   : > { %v1097_v42 = vrot.slane %v1061_v62, 2  ;;  %v1064_v22 = vmul.f32 %v1041_v33, %v1863_v26  ;;  %v1063_v21 = vmul.f32 %v1044_v25, %v1952_v47  ;;  %v211_v44 = vrot.slane %v206_v41, %v1706_v4 }
  0xd6   : > { %767 = vrot.lane.b32.xlu1 %v748_v51, %s1629_s29  ;;  %765 = vrot.lane.b32.xlu0 %v746_v52, %s1629_s29  ;;  %v1081_v51 = vrot.slane %v1055_v13, 2  ;;  %v1053_v52 = vmul.f32 %v1044_v25, %v1821_v61  ;;  %v1090_v2 = vrot.slane %v1058_v53, 2  ;;  %v1093_v20 = vrot.slane %v1059_v17, 2 }
  0xd7   : > { %v1098_v16 = vsel %vm844_vm3, %v1084_v45, %v1097_v42  ;;  %v1103_v19 = vrot.slane %v1064_v22, 2  ;;  %v1101_v9 = vrot.slane %v1063_v21, 2  ;;  %v215_v45 = vrot.slane %v206_v41, %v1710_v6 }
  0xd8   : > { %v1082_v1 = vsel %vm844_vm3, %v1080_v48, %v1081_v51  ;;  %v1089_v29 = vrot.slane %v1053_v52, 2 }
  0xd9   : > { %v1104_v34 = vsel %vm844_vm3, %v1093_v20, %v1103_v19  ;;  %v1102_v28 = vsel %vm844_vm3, %v1090_v2, %v1101_v9 }
  0xda   : > { %973 = vrot.lane.b32.xlu1 %v951_v0, %s1630_s25  ;;  %769 = vrot.lane.b32.xlu0 %v750_v11, %s1629_s29  ;;  %v1060_v0 = vmul.f32 %v1035_v18, %v1848_v15  ;;  %v1086_v11 = vrot.slane %v1052_v54, 2  ;;  %v1091_v56 = vsel %vm844_vm3, %v1089_v29, %v1090_v2  ;;  %v1092_v18 = vrot.slane %v1054_v14, 2 }
  0xdc   : > { %v1095_v10 = vrot.slane %v1060_v0, 2 }
  0xde   : > { %977 = vrot.lane.b32.xlu1 %v957_v12, %s1630_s25  ;;  %975 = vrot.lane.b32.xlu0 %v954_v49, %s1630_s25  ;;  %v1087_v12 = vrot.slane %v1057_v30, 2  ;;  %v1062_v49 = vmul.f32 %v1043_v46, %v1933_v32  ;;  %v1096_v23 = vsel %vm844_vm3, %v1081_v51, %v1095_v10  ;;  %v184_v46 = vld [vmem:[%s2390_s2] sm:$0xf]  ;;  %v228_v30 = vmul.f32 %v211_v44, %v1786_v37 }
  0xdf   : > { %v189_v54 = vrot.slane %v184_v46, %v1706_v4  ;;  %v197_v62 = vrot.slane %v184_v46, %v1704_v3 }
  0xe0   : > { %v1088_v50 = vsel %vm844_vm3, %v1086_v11, %v1087_v12  ;;  %v1099_v43 = vrot.slane %v1062_v49, 2  ;;  %v201_v49 = vrot.slane %v184_v46, %v1708_v5 }
  0xe1   : > { %v236_v14 = vadd.f32 %v228_v30, %v189_v54 }
  0xe2   : > { %981 = vrot.lane.b32.xlu1 %v962_v24, %s1630_s25  ;;  %979 = vrot.lane.b32.xlu0 %v960_v27, %s1630_s25  ;;  %v1094_v24 = vsel %vm844_vm3, %v1092_v18, %v1093_v20  ;;  %v1100_v27 = vsel %vm844_vm3, %v1087_v12, %v1099_v43 }
  0xe6   : > { %985 = vrot.lane.b32.xlu1 %v966_v39, %s1630_s25  ;;  %983 = vrot.lane.b32.xlu0 %v964_v35, %s1630_s25 }
  0xea   : > { %989 = vrot.lane.b32.xlu1 %v970_v55, %s1630_s25  ;;  %987 = vrot.lane.b32.xlu0 %v968_v59, %s1630_s25  ;;  %v193_v55 = vrot.slane %v184_v46, %v1710_v6  ;;  %v229_v59 = vmul.f32 %v215_v45, %v1811_v57 }
  0xec   : > { %v237_v17 = vadd.f32 %v229_v59, %v193_v55 }
  0xee   : > { %1107 = vrot.lane.b32.xlu1 %v1085_v60, %s1629_s29  ;;  %1105 = vrot.lane.b32.xlu0 %v1082_v1, %s1629_s29  ;;  %v219_v60 = vrot.slane %v206_v41, %v1704_v3  ;;  %v223_v1 = vrot.slane %v206_v41, %v1708_v5 }
  0xf0   : > { %v231_v10 = vmul.f32 %v223_v1, %v1821_v61  ;;  %v234_v21 = vmul.f32 %v219_v60, %v1832_v7 }
  0xf2   : > { %1111 = vrot.lane.b32.xlu1 %v1091_v56, %s1629_s29  ;;  %1109 = vrot.lane.b32.xlu0 %v1088_v50, %s1629_s29  ;;  %v232_v56 = vmul.f32 %v211_v44, %v1783_v36  ;;  %v230_v50 = vmul.f32 %v219_v60, %v1814_v58 }
  0xf4   : > { %v238_v9 = vadd.f32 %v230_v50, %v197_v62 }
  0xf6   : > { %1115 = vrot.lane.b32.xlu1 %v1096_v23, %s1629_s29  ;;  %1113 = vrot.lane.b32.xlu0 %v1094_v24, %s1629_s29  ;;  %v240_v23 = vadd.f32 %v232_v56, %v189_v54  ;;  %v233_v24 = vmul.f32 %v215_v45, %v1825_v63  ;;  %v242_v45 = vadd.f32 %v234_v21, %v197_v62 }
  0xf8   : > { %v241_v44 = vadd.f32 %v233_v24, %v193_v55  ;;  %v1456_v24 = vld [vmem:[%s2389_s1 + $0x20] ss:$4 sm:$0xf] }
  0xfa   : > { %1119 = vrot.lane.b32.xlu1 %v1100_v27, %s1629_s29  ;;  %1117 = vrot.lane.b32.xlu0 %v1098_v16, %s1629_s29  ;;  %v235_v27 = vmul.f32 %v223_v1, %v1835_v8 }
  0xfc   : > { %v311_v26 = vpop.permute.xlu1 %310  ;;  %v301_v33 = vpop.permute.xlu0 %300  ;;  %v243_v54 = vadd.f32 %v235_v27, %v201_v49 }
  0xfe   : > { %1123 = vrot.lane.b32.xlu1 %v1104_v34, %s1629_s29  ;;  %1121 = vrot.lane.b32.xlu0 %v1102_v28, %s1629_s29 }
 0x100   : > { %v319_v13 = vpop.permute.xlu1 %318  ;;  %v309_v38 = vpop.permute.xlu0 %308 }
 0x104   : > { %v412_v25 = vpop.permute.xlu1 %411  ;;  %v402_v39 = vpop.permute.xlu0 %401 }
 0x108   : > { %v2071_v35 = vpop.permute.xlu1 %419  ;;  %v410_v40 = vpop.permute.xlu0 %409 }
 0x10c   : > { %v303_v48 = vpop.permute.xlu1 %302  ;;  %v305_v51 = vpop.permute.xlu0 %304 }
 0x10d   : > { %v321_v52 = vsel %vm320_vm4, %v301_v33, %v303_v48  ;;  %v322_v53 = vsel %vm320_vm4, %v303_v48, %v305_v51 }
 0x10e   : > { %v337_v16 = vadd.f32 %v321_v52, %v236_v14  ;;  %v338_v19 = vadd.f32 %v322_v53, %v237_v17 }
 0x110   : > { %v307_v29 = vpop.permute.xlu1 %306  ;;  %v313_v2 = vpop.permute.xlu0 %312 }
 0x111   : > { %v323_v0 = vsel %vm320_vm4, %v305_v51, %v307_v29  ;;  %v324_v11 = vsel %vm320_vm4, %v307_v29, %v309_v38  ;;  %v325_v12 = vsel %vm320_vm4, %v311_v26, %v313_v2  ;;  %v239_v26 = vadd.f32 %v231_v10, %v201_v49  ;;  %v1453_v10 = vld [vmem:[%s2389_s1 + $0x10] ss:$4 sm:$0xf] }
 0x112   : > { %v339_v46 = vadd.f32 %v323_v0, %v238_v9  ;;  %v341_v51 = vadd.f32 %v325_v12, %v240_v23  ;;  %v463_v21 = vrot.slane %v1453_v10, %v1708_v5  ;;  %v455_v27 = vrot.slane %v1453_v10, %v1710_v6 }
 0x113   : > { %v340_v48 = vadd.f32 %v324_v11, %v239_v26  ;;  %v459_v9 = vrot.slane %v1453_v10, %v1704_v3 }
 0x114   : > { %v315_v18 = vpop.permute.xlu1 %314  ;;  %v317_v20 = vpop.permute.xlu0 %316 }
 0x115   : > { %v326_v42 = vsel %vm320_vm4, %v313_v2, %v315_v18  ;;  %v327_v43 = vsel %vm320_vm4, %v315_v18, %v317_v20  ;;  %v328_v22 = vsel %vm320_vm4, %v317_v20, %v319_v13  ;;  %v451_v18 = vrot.slane %v1453_v10, %v1706_v4 }
 0x116   : > { %v342_v55 = vadd.f32 %v326_v42, %v241_v44  ;;  %v343_v2 = vadd.f32 %v327_v43, %v242_v45  ;;  %v344_v0 = vadd.f32 %v328_v22, %v243_v54  ;;  %v475_v44 = vmul.f32 %v463_v21, %v1835_v8 }
 0x117   : > { %v468_v43 = vmul.f32 %v451_v18, %v1786_v37  ;;  %v469_v45 = vmul.f32 %v455_v27, %v1811_v57  ;;  %v474_v54 = vmul.f32 %v459_v9, %v1832_v7 }
 0x118   : > { %v404_v33 = vpop.permute.xlu1 %403  ;;  %v406_v34 = vpop.permute.xlu0 %405 }
 0x119   : > { %v421_v28 = vsel %vm372_vm1, %v402_v39, %v404_v33  ;;  %v422_v38 = vsel %vm372_vm1, %v404_v33, %v406_v34 }
 0x11a   : > { %v2105_v41 = vadd.f32 %v421_v28, %v337_v16  ;;  %v2107_v13 = vadd.f32 %v422_v38, %v338_v19  ;;  %v493_v19 = vrot.slane %v468_v43, 1  ;;  %v807_v28 = vrot.slane %v1456_v24, %v1710_v6 }
 0x11b   : > { %v471_v38 = vmul.f32 %v463_v21, %v1821_v61  ;;  %v477_v6 = vmul.f32 %v455_v27, %v1930_v31  ;;  %v815_v43 = vrot.slane %v1456_v24, %v1708_v5 }
 0x11c   : > { %v408_v52 = vpop.permute.xlu1 %407  ;;  %v414_v53 = vpop.permute.xlu0 %413 }
 0x11d   : > { %v423_v30 = vsel %vm372_vm1, %v406_v34, %v408_v52  ;;  %v424_v59 = vsel %vm372_vm1, %v408_v52, %v410_v40  ;;  %v425_v39 = vsel %vm372_vm1, %v412_v25, %v414_v53  ;;  %v803_v34 = vrot.slane %v1456_v24, %v1706_v4 }
 0x11e   : > { %v2112_v60 = vadd.f32 %v423_v30, %v339_v46  ;;  %v2114_v1 = vadd.f32 %v424_v59, %v340_v48  ;;  %v2116_v29 = vadd.f32 %v425_v39, %v341_v51  ;;  %v473_v46 = vmul.f32 %v455_v27, %v1825_v63 }
 0x11f   : > { %v470_v51 = vmul.f32 %v459_v9, %v1814_v58  ;;  %v476_v52 = vmul.f32 %v451_v18, %v1848_v15  ;;  %v478_v30 = vmul.f32 %v459_v9, %v1933_v32  ;;  %v479_v59 = vmul.f32 %v463_v21, %v1952_v47 }
 0x120   : > { %v416_v11 = vpop.permute.xlu1 %415  ;;  %v418_v12 = vpop.permute.xlu0 %417  ;;  %v2172_v39 = vmul.f32 %v803_v34, %v1783_v36  ;;  %v507_v27 = vrot.slane %v477_v6, 1  ;;  %v828_v5 = vmul.f32 %v803_v34, %v1848_v15 }
 0x121   : > { %v426_v14 = vsel %vm372_vm1, %v414_v53, %v416_v11  ;;  %v427_v17 = vsel %vm372_vm1, %v416_v11, %v418_v12  ;;  %v428_v40 = vsel %vm372_vm1, %v418_v12, %v2071_v35  ;;  %v472_v35 = vmul.f32 %v451_v18, %v1783_v36 }
 0x122   : > { %v2122_v56 = vadd.f32 %v426_v14, %v342_v55  ;;  %v2124_v25 = vadd.f32 %v427_v17, %v343_v2  ;;  %v2126_v62 = vadd.f32 %v428_v40, %v344_v0  ;;  %v820_v55 = vmul.f32 %v803_v34, %v1786_v37 }
 0x123   : > { %v494_v16 = vrot.slane %v472_v35, 1  ;;  %v811_v2 = vrot.slane %v1456_v24, %v1704_v3  ;;  %v821_v0 = vmul.f32 %v807_v28, %v1811_v57  ;;  %v2178_v11 = vmul.f32 %v807_v28, %v1825_v63 }
 0x124   : > { %v2128_v49 = vpop.permute.xlu1 %629  ;;  %v2130_v50 = vpop.permute.xlu0 %619  ;;  %v502_v12 = vrot.slane %v471_v38, 1  ;;  %v503_v14 = vrot.slane %v475_v44, 1  ;;  %v496_v17 = vrot.slane %v469_v45, 1  ;;  %v497_v40 = vrot.slane %v473_v46, 1 }
 0x125   : > { %v495_v48 = vsel %vm492_vm2, %v493_v19, %v494_v16  ;;  %v499_v10 = vrot.slane %v470_v51, 1  ;;  %v500_v18 = vrot.slane %v474_v54, 1  ;;  %v505_v35 = vrot.slane %v476_v52, 1 }
 0x126   : > { %v509_v37 = vrot.slane %v478_v30, 1  ;;  %v511_v19 = vrot.slane %v479_v59, 1  ;;  %v846_v3 = vrot.slane %v2172_v39, 2  ;;  %v845_v57 = vrot.slane %v820_v55, 2 }
 0x127   : > { %v822_v63 = vmul.f32 %v811_v2, %v1814_v58  ;;  %v848_v9 = vrot.slane %v821_v0, 2  ;;  %v849_v38 = vrot.slane %v2178_v11, 2  ;;  %v498_v44 = vsel %vm492_vm2, %v496_v17, %v497_v40 }
 0x128   : > { %v2136_v20 = vpop.permute.xlu1 %637  ;;  %v2138_v42 = vpop.permute.xlu0 %627  ;;  %v2186_v45 = vmul.f32 %v811_v2, %v1832_v7  ;;  %v829_v24 = vmul.f32 %v807_v28, %v1930_v31  ;;  %v504_v46 = vsel %vm492_vm2, %v502_v12, %v503_v14  ;;  %v501_v51 = vsel %vm492_vm2, %v499_v10, %v500_v18 }
 0x129   : > { %v823_v54 = vmul.f32 %v815_v43, %v1821_v61  ;;  %v2194_v58 = vmul.f32 %v815_v43, %v1835_v8  ;;  %v506_v6 = vsel %vm492_vm2, %v494_v16, %v505_v35  ;;  %v508_v30 = vsel %vm492_vm2, %v497_v40, %v507_v27 }
 0x12a   : > { %v510_v59 = vsel %vm492_vm2, %v500_v18, %v509_v37  ;;  %v512_v15 = vsel %vm492_vm2, %v503_v14, %v511_v19  ;;  %v847_v61 = vsel %vm844_vm3, %v845_v57, %v846_v3  ;;  %v850_v8 = vsel %vm844_vm3, %v848_v9, %v849_v38 }
 0x12b   : > { %v851_v34 = vrot.slane %v822_v63, 2  ;;  %v521_v28 = vadd.f32 %v495_v48, %v2105_v41  ;;  %v852_v16 = vrot.slane %v2186_v45, 2  ;;  %v857_v55 = vrot.slane %v828_v5, 2 }
 0x12c   : > { %v2142_v22 = vpop.permute.xlu1 %763  ;;  %v2144_v23 = vpop.permute.xlu0 %753  ;;  %v859_v0 = vrot.slane %v829_v24, 2  ;;  %v854_v11 = vrot.slane %v823_v54, 2  ;;  %v855_v12 = vrot.slane %v2194_v58, 2  ;;  %v830_v14 = vmul.f32 %v811_v2, %v1933_v32 }
 0x12d   : > { %v524_v40 = vadd.f32 %v504_v46, %v2114_v1  ;;  %v528_v41 = vadd.f32 %v512_v15, %v2126_v62  ;;  %v523_v1 = vadd.f32 %v501_v51, %v2112_v60  ;;  %v525_v62 = vadd.f32 %v506_v6, %v2116_v29 }
 0x12e   : > { %v860_v54 = vsel %vm844_vm3, %v849_v38, %v859_v0  ;;  %v861_v58 = vrot.slane %v830_v14, 2  ;;  %v527_v39 = vadd.f32 %v510_v59, %v2124_v25 }
 0x130   : > { %v2152_v26 = vpop.permute.xlu1 %771  ;;  %v2154_v33 = vpop.permute.xlu0 %761 }
 0x134   : > { %v622_v53 = vpop.permute.xlu1 %621  ;;  %v2166_v4 = vpop.permute.xlu0 %971 }
 0x135   : > { %v639_v31 = vsel %vm320_vm4, %v2130_v50, %v622_v53  ;;  %v831_v50 = vmul.f32 %v815_v43, %v1952_v47  ;;  %v522_v47 = vadd.f32 %v498_v44, %v2107_v13  ;;  %v526_v44 = vadd.f32 %v508_v30, %v2122_v56 }
 0x136   : > { %v655_v17 = vadd.f32 %v639_v31, %v521_v28 }
 0x137   : > { %v863_v28 = vrot.slane %v831_v50, 2 }
 0x138   : > { %v626_v36 = vpop.permute.xlu1 %625  ;;  %v624_v21 = vpop.permute.xlu0 %623 }
 0x139   : > { %v642_v10 = vsel %vm320_vm4, %v626_v36, %v2138_v42  ;;  %v640_v35 = vsel %vm320_vm4, %v622_v53, %v624_v21  ;;  %v641_v27 = vsel %vm320_vm4, %v624_v21, %v626_v36  ;;  %v853_v53 = vsel %vm844_vm3, %v851_v34, %v852_v16 }
 0x13a   : > { %v658_v43 = vadd.f32 %v642_v10, %v524_v40  ;;  %v856_v36 = vsel %vm844_vm3, %v854_v11, %v855_v12  ;;  %v656_v21 = vadd.f32 %v640_v35, %v522_v47  ;;  %v864_v50 = vsel %vm844_vm3, %v855_v12, %v863_v28 }
 0x13c   : > { %v634_v52 = vpop.permute.xlu1 %633  ;;  %v632_v7 = vpop.permute.xlu0 %631 }
 0x13d   : > { %v644_v60 = vsel %vm320_vm4, %v632_v7, %v634_v52 }
 0x13e   : > { %v660_v6 = vadd.f32 %v644_v60, %v526_v44 }
 0x140   : > { %v756_v18 = vpop.permute.xlu1 %755  ;;  %v636_v48 = vpop.permute.xlu0 %635 }
 0x141   : > { %v773_v37 = vsel %vm372_vm1, %v2144_v23, %v756_v18  ;;  %v646_v32 = vsel %vm320_vm4, %v636_v48, %v2136_v20  ;;  %v657_v23 = vadd.f32 %v641_v27, %v523_v1  ;;  %v643_v20 = vsel %vm320_vm4, %v2128_v49, %v632_v7 }
 0x142   : > { %v789_v2 = vadd.f32 %v773_v37, %v655_v17  ;;  %v662_v42 = vadd.f32 %v646_v32, %v528_v41  ;;  %v659_v51 = vadd.f32 %v643_v20, %v525_v62  ;;  %v858_v49 = vsel %vm844_vm3, %v846_v3, %v857_v55 }
 0x143   : > { %v645_v34 = vsel %vm320_vm4, %v634_v52, %v636_v48 }
 0x144   : > { %v760_v19 = vpop.permute.xlu1 %759  ;;  %v758_v13 = vpop.permute.xlu0 %757  ;;  %v873_v57 = vadd.f32 %v847_v61, %v789_v2  ;;  %v661_v38 = vadd.f32 %v645_v34, %v527_v39 }
 0x145   : > { %v776_v63 = vsel %vm372_vm1, %v760_v19, %v2154_v33  ;;  %v774_v29 = vsel %vm372_vm1, %v756_v18, %v758_v13  ;;  %v775_v9 = vsel %vm372_vm1, %v758_v13, %v760_v19 }
 0x146   : > { %v792_v5 = vadd.f32 %v776_v63, %v658_v43  ;;  %v790_v24 = vadd.f32 %v774_v29, %v656_v21  ;;  %v791_v46 = vadd.f32 %v775_v9, %v657_v23 }
 0x148   : > { %v768_v7 = vpop.permute.xlu1 %767  ;;  %v766_v33 = vpop.permute.xlu0 %765  ;;  %v874_v15 = vadd.f32 %v850_v8, %v790_v24  ;;  %v875_v31 = vadd.f32 %v853_v53, %v791_v46  ;;  %v876_v61 = vadd.f32 %v856_v36, %v792_v5 }
 0x149   : > { %v777_v56 = vsel %vm372_vm1, %v2142_v22, %v766_v33  ;;  %v778_v30 = vsel %vm372_vm1, %v766_v33, %v768_v7  ;;  %v862_v22 = vsel %vm844_vm3, %v852_v16, %v861_v58 }
 0x14a   : > { %v793_v3 = vadd.f32 %v777_v56, %v659_v51  ;;  %v794_v55 = vadd.f32 %v778_v30, %v660_v6 }
 0x14c   : > { %v974_v0 = vpop.permute.xlu1 %973  ;;  %v770_v11 = vpop.permute.xlu0 %769  ;;  %v877_v14 = vadd.f32 %v858_v49, %v793_v3  ;;  %v878_v17 = vadd.f32 %v860_v54, %v794_v55 }
 0x14d   : > { %v779_v8 = vsel %vm372_vm1, %v768_v7, %v770_v11  ;;  %v780_v52 = vsel %vm372_vm1, %v770_v11, %v2152_v26  ;;  %v991_v26 = vsel %vm320_vm4, %v2166_v4, %v974_v0 }
 0x14e   : > { %v795_v40 = vadd.f32 %v779_v8, %v661_v38  ;;  %v796_v25 = vadd.f32 %v780_v52, %v662_v42  ;;  %v1007_v45 = vadd.f32 %v991_v26, %v873_v57 }
 0x150   : > { %v978_v59 = vpop.permute.xlu1 %977  ;;  %v976_v10 = vpop.permute.xlu0 %975  ;;  %v879_v18 = vadd.f32 %v862_v22, %v795_v40  ;;  %v880_v41 = vadd.f32 %v864_v50, %v796_v25 }
 0x151   : > { %v992_v12 = vsel %vm320_vm4, %v974_v0, %v976_v10  ;;  %v993_v2 = vsel %vm320_vm4, %v976_v10, %v978_v59 }
 0x152   : > { %v1008_v62 = vadd.f32 %v992_v12, %v874_v15  ;;  %v1009_v53 = vadd.f32 %v993_v2, %v875_v31 }
 0x154   : > { %v982_v48 = vpop.permute.xlu1 %981  ;;  %v980_v35 = vpop.permute.xlu0 %979 }
 0x155   : > { %v994_v20 = vsel %vm320_vm4, %v978_v59, %v980_v35 }
 0x156   : > { %v1010_v60 = vadd.f32 %v994_v20, %v876_v61 }
 0x158   : > { %v986_v27 = vpop.permute.xlu1 %985  ;;  %v984_v37 = vpop.permute.xlu0 %983 }
 0x159   : > { %v995_v5 = vsel %vm320_vm4, %v982_v48, %v984_v37  ;;  %v996_v24 = vsel %vm320_vm4, %v984_v37, %v986_v27 }
 0x15a   : > { %v1011_v49 = vadd.f32 %v995_v5, %v877_v14  ;;  %v1012_v54 = vadd.f32 %v996_v24, %v878_v17 }
 0x15c   : > { %v990_v32 = vpop.permute.xlu1 %989  ;;  %v988_v47 = vpop.permute.xlu0 %987 }
 0x15d   : > { %v997_v33 = vsel %vm320_vm4, %v986_v27, %v988_v47  ;;  %v998_v15 = vsel %vm320_vm4, %v988_v47, %v990_v32 }
 0x15e   : > { %v1013_v28 = vadd.f32 %v997_v33, %v879_v18  ;;  %v1014_v39 = vadd.f32 %v998_v15, %v880_v41 }
 0x160   : > { %v1108_v1 = vpop.permute.xlu1 %1107  ;;  %v1106_v16 = vpop.permute.xlu0 %1105 }
 0x161   : > { %v1125_v42 = vsel %vm372_vm1, %v1106_v16, %v1108_v1 }
 0x162   : > { %v1141_v43 = vadd.f32 %v1125_v42, %v1007_v45 }
 0x164   : > { %v1459_v36 = vmul.f32 -1.442695, %v1141_v43  ;;  %v1112_v21 = vpop.permute.xlu1 %1111  ;;  %v1110_v23 = vpop.permute.xlu0 %1109 }
 0x165   : > { %v1126_v19 = vsel %vm372_vm1, %v1108_v1, %v1110_v23  ;;  %v1127_v4 = vsel %vm372_vm1, %v1110_v23, %v1112_v21 }
 0x166   : > { %1517 = vpow2.f32 %v1459_v36  ;;  %v1142_v13 = vadd.f32 %v1126_v19, %v1008_v62  ;;  %v1143_v57 = vadd.f32 %v1127_v4, %v1009_v53 }
 0x168   : > { %v1460_v63 = vmul.f32 -1.442695, %v1142_v13  ;;  %v1461_v29 = vmul.f32 -1.442695, %v1143_v57  ;;  %v1116_v9 = vpop.permute.xlu1 %1115  ;;  %v1114_v44 = vpop.permute.xlu0 %1113 }
 0x169   : > { %v1128_v46 = vsel %vm372_vm1, %v1112_v21, %v1114_v44 }
 0x16a   : > { %1519 = vpow2.f32 %v1460_v63  ;;  %v1144_v51 = vadd.f32 %v1128_v46, %v1010_v60 }
 0x16b   : > { %1521 = vpow2.f32 %v1461_v29 }
 0x16c   : > { %v1462_v58 = vmul.f32 -1.442695, %v1144_v51  ;;  %v1120_v6 = vpop.permute.xlu1 %1119  ;;  %v1118_v7 = vpop.permute.xlu0 %1117 }
 0x16d   : > { %v1129_v31 = vsel %vm372_vm1, %v1116_v9, %v1118_v7  ;;  %v1130_v61 = vsel %vm372_vm1, %v1118_v7, %v1120_v6 }
 0x16e   : > { %1523 = vpow2.f32 %v1462_v58  ;;  %v1145_v34 = vadd.f32 %v1129_v31, %v1011_v49  ;;  %v1146_v56 = vadd.f32 %v1130_v61, %v1012_v54  ;;  %v1549_v54 = vld [vmem:[%s1780_s24] sm:$0xff]  ;;  %v1551_v61 = vld [vmem:[%s1780_s24 + $0x28] sm:$0xff] }
 0x170   : > { %v1518_v30 = vpop.eup %1517  ;;  %v1463_v3 = vmul.f32 -1.442695, %v1145_v34  ;;  %v1464_v55 = vmul.f32 -1.442695, %v1146_v56  ;;  %v1124_v38 = vpop.permute.xlu1 %1123 }
 0x171   : > { %v1122_v0 = vpop.permute.xlu0 %1121  ;;  %v1173_v11 = vadd.f32 1.0, %v1518_v30 }
 0x172   : > { %v1131_v14 = vsel %vm372_vm1, %v1120_v6, %v1122_v0  ;;  %v1132_v17 = vsel %vm372_vm1, %v1122_v0, %v1124_v38  ;;  %1525 = vpow2.f32 %v1463_v3  ;;  %v1550_v6 = vld [vmem:[%s1780_s24 + $0x50] sm:$0x3] }
 0x173   : > { %v1147_v8 = vadd.f32 %v1131_v14, %v1013_v28  ;;  %v1148_v52 = vadd.f32 %v1132_v17, %v1014_v39  ;;  %1527 = vpow2.f32 %v1464_v55  ;;  %v1552_v28 = vld [vmem:[%s1780_s24 + $0x8] sm:$0xff]  ;;  %v1553_v55 = vld [vmem:[%s1780_s24 + $0x30] sm:$0xff]  ;;  %v1554_v17 = vld [vmem:[%s1780_s24 + $0x20] sm:$0xff] }
 0x174   : > { %v1520_v22 = vpop.eup %1519  ;;  %1529 = vrcp.f32 %v1173_v11 }
 0x175   : > { %v1465_v50 = vmul.f32 -1.442695, %v1147_v8  ;;  %v1466_v40 = vmul.f32 -1.442695, %v1148_v52  ;;  %v1522_v25 = vpop.eup %1521  ;;  %v1174_v59 = vadd.f32 1.0, %v1520_v22 }
 0x176   : > { %v1175_v10 = vadd.f32 1.0, %v1522_v25 }
 0x177   : > { %1531 = vpow2.f32 %v1465_v50 }
 0x178   : > { %1533 = vpow2.f32 %v1466_v40  ;;  %v1524_v18 = vpop.eup %1523 }
 0x179   : > { %1535 = vrcp.f32 %v1174_v59  ;;  %v1176_v41 = vadd.f32 1.0, %v1524_v18 }
 0x17a   : > { %1537 = vrcp.f32 %v1175_v10  ;;  %v1555_v10 = vld [vmem:[%s1780_s24 + $0x48] sm:$0xff] }
 0x17b   : > { %1539 = vrcp.f32 %v1176_v41 }
 0x17c   : > { %v1526_v48 = vpop.eup %1525 }
 0x17d   : > { %v1528_v35 = vpop.eup %1527  ;;  %v1177_v27 = vadd.f32 1.0, %v1526_v48  ;;  %v1556_v48 = vld [vmem:[%s1780_s24 + $0x38] sm:$0xff] }
 0x17e   : > { %v1530_v37 = vpop.eup %1529  ;;  %v1178_v32 = vadd.f32 1.0, %v1528_v35 }
 0x17f   : > { %v1206_v47 = vrot.slane %v1530_v37, 7  ;;  %1541 = vrcp.f32 %v1177_v27  ;;  %v1557_v37 = vld [vmem:[%s1780_s24 + $0x18] sm:$0xff] }
 0x180   : > { %1543 = vrcp.f32 %v1178_v32 }
 0x181   : > { %v1532_v26 = vpop.eup %1531  ;;  %1218 = vrot.lane.b32.xlu0 %v1206_v47, %s1628_s26 }
 0x182   : > { %v1534_v45 = vpop.eup %1533  ;;  %v1179_v1 = vadd.f32 1.0, %v1532_v26 }
 0x183   : > { %v1536_v16 = vpop.eup %1535  ;;  %v1180_v12 = vadd.f32 1.0, %v1534_v45  ;;  %v1559_v45 = vld [vmem:[%s1780_s24 + $0x10] sm:$0xff] }
 0x184   : > { %v1538_v2 = vpop.eup %1537  ;;  %1545 = vrcp.f32 %v1179_v1  ;;  %v1207_v42 = vrot.slane %v1536_v16, 7 }
 0x185   : > { %1547 = vrcp.f32 %v1180_v12  ;;  %v1208_v43 = vrot.slane %v1538_v2, 7  ;;  %v1540_v62 = vpop.eup %1539 }
 0x186   : > { %1220 = vrot.lane.b32.xlu1 %v1207_v42, %s1628_s26  ;;  %v1209_v53 = vrot.slane %v1540_v62, 7 }
 0x187   : > { %1222 = vrot.lane.b32.xlu0 %v1208_v43, %s1628_s26 }
 0x189   : > { %v1542_v36 = vpop.eup %1541 }
 0x18a   : > { %1224 = vrot.lane.b32.xlu1 %v1209_v53, %s1628_s26  ;;  %v1544_v21 = vpop.eup %1543  ;;  %v1210_v23 = vrot.slane %v1542_v36, 7 }
 0x18b   : > { %v1212_v20 = vrot.slane %v1544_v21, 7 }
 0x18c   : > { %1234 = vrot.lane.b32.xlu0 %v1210_v23, %s1628_s26  ;;  %v1211_v19 = vsel %vm1205_vm5, %v1206_v47, %v1210_v23  ;;  %v1558_v47 = vld [vmem:[%s1780_s24 + $0x40] sm:$0xff] }
 0x18d   : > { %v1213_v13 = vsel %vm1205_vm5, %v1207_v42, %v1212_v20  ;;  %v1560_v23 = vld [vmem:[%s1780_s24 + $0x60] sm:$0x3] }
 0x18e   : > { %v1546_v4 = vpop.eup %1545  ;;  %1236 = vrot.lane.b32.xlu1 %v1212_v20, %s1628_s26 }
 0x18f   : > { %v1548_v57 = vpop.eup %1547  ;;  %v1214_v60 = vrot.slane %v1546_v4, 7 }
 0x190   : > { %v1216_v63 = vrot.slane %v1548_v57, 7  ;;  %1226 = vrot.lane.b32.xlu0 %v1211_v19, %s1628_s26 }
 0x191   : > { %v1215_v29 = vsel %vm1205_vm5, %v1208_v43, %v1214_v60 }
 0x192   : > { %1228 = vrot.lane.b32.xlu1 %v1213_v13, %s1628_s26  ;;  %v1217_v9 = vsel %vm1205_vm5, %v1209_v53, %v1216_v63 }
 0x194   : > { %1230 = vrot.lane.b32.xlu0 %v1215_v29, %s1628_s26  ;;  %v1562_v29 = vld [vmem:[%s1780_s24 + $0x70] sm:$0x3] }
 0x196   : > { %1232 = vrot.lane.b32.xlu1 %v1217_v9, %s1628_s26 }
 0x198   : > { %1238 = vrot.lane.b32.xlu0 %v1214_v60, %s1628_s26  ;;  %v1561_v60 = vld [vmem:[%s1780_s24 + $0x58] sm:$0x3] }
 0x19a   : > { %1240 = vrot.lane.b32.xlu1 %v1216_v63, %s1628_s26 }
 0x1f3   : > { %v1219_v44 = vpop.permute.xlu0 %1218 }
 0x1f4   : > { %v1266_v58 = vmul.f32 %v1549_v54, %v1219_v44 }
 0x1f6   : > { %v1296_v56 = vrot.slane %v1266_v58, 1 }
 0x1f8   : > { %v1221_v5 = vpop.permute.xlu1 %1220 }
 0x1f9   : > { %v1223_v24 = vpop.permute.xlu0 %1222  ;;  %v1242_v33 = vsel %vm271_vm0, %v1219_v44, %v1221_v5 }
 0x1fa   : > { %v1267_v39 = vmul.f32 %v1552_v28, %v1242_v33  ;;  %v1243_v11 = vsel %vm271_vm0, %v1221_v5, %v1223_v24 }
 0x1fb   : > { %v1268_v1 = vmul.f32 %v1559_v45, %v1243_v11 }
 0x1fc   : > { %v1225_v46 = vpop.permute.xlu1 %1224  ;;  %v1299_v27 = vrot.slane %v1267_v39, 1 }
 0x1fd   : > { %v1244_v14 = vsel %vm271_vm0, %v1223_v24, %v1225_v46  ;;  %v1270_v8 = vmul.f32 %v1554_v17, %v1225_v46  ;;  %v1302_v57 = vrot.slane %v1268_v1, 1  ;;  %v1563_v24 = vld [vmem:[%s1780_s24 + $0x68] sm:$0x3]  ;;  %s2338_s24 = scalar_lea.hbm %s2391_s3, %s1472_s11 }
 0x1fe   : > { %v1235_v51 = vpop.permute.xlu0 %1234  ;;  %v1269_v32 = vmul.f32 %v1557_v37, %v1244_v14 }
 0x1ff   : > { %v1276_v7 = vmul.f32 %v1550_v6, %v1235_v51  ;;  %v1308_v16 = vrot.slane %v1270_v8, 1 }
 0x200   : > { %v1237_v49 = vpop.permute.xlu1 %1236  ;;  %v1305_v4 = vrot.slane %v1269_v32, 1 }
 0x201   : > { %v1311_v3 = vrot.slane %v1276_v7, 1  ;;  %v1248_v42 = vsel %vm271_vm0, %v1235_v51, %v1237_v49 }
 0x202   : > { %v1227_v15 = vpop.permute.xlu0 %1226  ;;  %v1277_v63 = vmul.f32 %v1561_v60, %v1248_v42 }
 0x203   : > { %v1271_v34 = vmul.f32 %v1551_v61, %v1227_v15 }
 0x204   : > { %v1229_v31 = vpop.permute.xlu1 %1228 }
 0x205   : > { %v1245_v30 = vsel %vm271_vm0, %v1227_v15, %v1229_v31  ;;  %v1297_v0 = vrot.slane %v1271_v34, 1 }
 0x206   : > { %v1272_v38 = vmul.f32 %v1553_v55, %v1245_v30  ;;  %v1231_v52 = vpop.permute.xlu0 %1230 }
 0x207   : > { %v1246_v40 = vsel %vm271_vm0, %v1229_v31, %v1231_v52  ;;  %v1312_v25 = vsel %vm492_vm2, %v1297_v0, %v1311_v3  ;;  %v1298_v59 = vsel %vm492_vm2, %v1296_v56, %v1297_v0 }
 0x208   : > { %v1300_v22 = vrot.slane %v1272_v38, 1  ;;  %v1233_v50 = vpop.permute.xlu1 %1232  ;;  %v1273_v35 = vmul.f32 %v1556_v48, %v1246_v40  ;;  %1331 = vrot.lane.b32.xlu1 %v1312_v25, %s1630_s25  ;;  %1321 = vrot.lane.b32.xlu0 %v1298_v59, %s1630_s25 }
 0x209   : > { %v1275_v18 = vmul.f32 %v1555_v10, %v1233_v50  ;;  %v1247_v41 = vsel %vm271_vm0, %v1231_v52, %v1233_v50 }
 0x20a   : > { %v1274_v26 = vmul.f32 %v1558_v47, %v1247_v41  ;;  %v1239_v2 = vpop.permute.xlu0 %1238  ;;  %v1301_v36 = vsel %vm492_vm2, %v1299_v27, %v1300_v22  ;;  %v1303_v21 = vrot.slane %v1273_v35, 1 }
 0x20b   : > { %v1309_v12 = vrot.slane %v1275_v18, 1  ;;  %v1249_v53 = vsel %vm271_vm0, %v1237_v49, %v1239_v2  ;;  %v1313_v49 = vrot.slane %v1277_v63, 1 }
 0x20c   : > { %v1306_v43 = vrot.slane %v1274_v26, 1  ;;  %v1241_v62 = vpop.permute.xlu1 %1240  ;;  %v1278_v20 = vmul.f32 %v1560_v23, %v1249_v53  ;;  %1323 = vrot.lane.b32.xlu1 %v1301_v36, %s1630_s25  ;;  %v1304_v51 = vsel %vm492_vm2, %v1302_v57, %v1303_v21 }
 0x20d   : > { %v1310_v19 = vsel %vm492_vm2, %v1308_v16, %v1309_v12  ;;  %v1250_v13 = vsel %vm271_vm0, %v1239_v2, %v1241_v62  ;;  %v1280_v9 = vmul.f32 %v1562_v29, %v1241_v62  ;;  %v1314_v7 = vsel %vm492_vm2, %v1300_v22, %v1313_v49 }
 0x20e   : > { %1329 = vrot.lane.b32.xlu0 %v1310_v19, %s1630_s25  ;;  %v1315_v44 = vrot.slane %v1278_v20, 1  ;;  %v1307_v5 = vsel %vm492_vm2, %v1305_v4, %v1306_v43  ;;  %v1279_v46 = vmul.f32 %v1563_v24, %v1250_v13 }
 0x20f   : > { %v1319_v54 = vrot.slane %v1280_v9, 1 }
 0x210   : > { %1327 = vrot.lane.b32.xlu1 %v1307_v5, %s1630_s25  ;;  %v1316_v58 = vsel %vm492_vm2, %v1303_v21, %v1315_v44  ;;  %v1317_v6 = vrot.slane %v1279_v46, 1 }
 0x211   : > { %v1320_v33 = vsel %vm492_vm2, %v1309_v12, %v1319_v54 }
 0x212   : > { %1325 = vrot.lane.b32.xlu0 %v1304_v51, %s1630_s25  ;;  %v1318_v15 = vsel %vm492_vm2, %v1306_v43, %v1317_v6 }
 0x214   : > { %1335 = vrot.lane.b32.xlu1 %v1316_v58, %s1630_s25 }
 0x216   : > { %1333 = vrot.lane.b32.xlu0 %v1314_v7, %s1630_s25 }
 0x218   : > { %1339 = vrot.lane.b32.xlu1 %v1320_v33, %s1630_s25 }
 0x21a   : > { %1337 = vrot.lane.b32.xlu0 %v1318_v15, %s1630_s25  ;;  %s1564_s25 = scalar_lea.vmem %s2340_s17, 1024 }
 0x21b   : > { %p1565_p11 = scmp.ne.s32.totalorder %s2340_s17, %s1564_s25  ;;  %p1572_p1 = scmp.lt.s32.totalorder %s1570_s30, %s1564_s25 }
 0x21d   : > { %p1566_p12 = pnand %p1565_p11, %p1691_p5  ;;  %p1573_p2 = por %p1572_p1, %p1571_p0 }
 0x21f   : > { %p1567_p13 = pneg %p1566_p12 }
 0x221   : > { %p1574_p3 = pnand %p1573_p2, %p1567_p13 }
 0x27a   : > { %v1332_v31 = vpop.permute.xlu1 %1331  ;;  %v1322_v61 = vpop.permute.xlu0 %1321 }
 0x27e   : > { %v1324_v34 = vpop.permute.xlu1 %1323 }
 0x27f   : > { %v1341_v56 = vsel %vm320_vm4, %v1322_v61, %v1324_v34 }
 0x280   : > { %v1330_v30 = vpop.permute.xlu0 %1329  ;;  %1357 = vst [vmem:[%s163_s10] sm:$0xff] %v1341_v56 }
 0x282   : > { %v1328_v28 = vpop.permute.xlu1 %1327 }
 0x283   : > { %v1344_v39 = vsel %vm320_vm4, %v1328_v28, %v1330_v30 }
 0x284   : > { %v1326_v3 = vpop.permute.xlu0 %1325  ;;  %1360 = vst [vmem:[%s163_s10 + $0x18] sm:$0xff] %v1344_v39 }
 0x285   : > { %v1342_v55 = vsel %vm320_vm4, %v1324_v34, %v1326_v3  ;;  %v1343_v38 = vsel %vm320_vm4, %v1326_v3, %v1328_v28 }
 0x286   : > { %1358 = vst [vmem:[%s163_s10 + $0x8] sm:$0xff] %v1342_v55  ;;  %1359 = vst [vmem:[%s163_s10 + $0x10] sm:$0xff] %v1343_v38  ;;  %v1336_v0 = vpop.permute.xlu1 %1335 }
 0x288   : > { %v1334_v11 = vpop.permute.xlu0 %1333 }
 0x289   : > { %v1345_v14 = vsel %vm320_vm4, %v1332_v31, %v1334_v11  ;;  %v1346_v17 = vsel %vm320_vm4, %v1334_v11, %v1336_v0 }
 0x28a   : > { %1361 = vst [vmem:[%s163_s10 + $0x20] sm:$0xff] %v1345_v14  ;;  %1362 = vst [vmem:[%s163_s10 + $0x28] sm:$0xff] %v1346_v17  ;;  %v1340_v8 = vpop.permute.xlu1 %1339 }
 0x28c   : > { %v1338_v52 = vpop.permute.xlu0 %1337 }
 0x28d   : > { %v1347_v22 = vsel %vm320_vm4, %v1336_v0, %v1338_v52  ;;  %v1348_v50 = vsel %vm320_vm4, %v1338_v52, %v1340_v8 }
 0x28e   : > { %1363 = vst [vmem:[%s163_s10 + $0x30] sm:$0xff] %v1347_v22  ;;  %1364 = vst [vmem:[%s163_s10 + $0x38] sm:$0xff] %v1348_v50 }
 0x28f   : > { %1577 = shalt.err (!%p1574_p3)
}
 0x290   : > { %s1578_s4 = scalar_lea.hbm %s2338_s24, 1024  ;;  %s1582_s6 = scalar_lea.hbm %s2391_s3, 2048 }
 0x291   : > { %p1579_p4 = scmp.ne.s32.totalorder %s2338_s24, %s1578_s4  ;;  %p1583_p9 = scmp.lt.u32.totalorder %s2338_s24, %s2391_s3 }
 0x292   : > { %p1584_p10 = scmp.lt.u32.totalorder %s1582_s6, %s1578_s4  ;;  %p1586_p12 = scmp.lt.u32.totalorder %s1578_s4, %s2338_s24 }
 0x293   : > { %p1580_p7 = pnand %p1579_p4, %p1691_p5 }
 0x294   : > { %p1585_p11 = por %p1584_p10, %p1583_p9 }
 0x295   : > { %p1581_p8 = pneg %p1580_p7 }
 0x296   : > { %p1587_p13 = por %p1586_p12, %p1585_p11 }
 0x298   : > { %p1588_p0 = pnand %p1587_p13, %p1581_p8 }
 0x29a   : > { %1591 = shalt.err (!%p1588_p0)
}
 0x29b   : > { %s1632_s9 = smov 512  }
 0x29c   : > { %1474 = dma.vmem_to_hbm [thread:$0]  (%p1691_p5), %s2340_s17, 1024, %s2338_s24, %s2346_s16, %s1632_s9, %s1632_s9, %s1628_s26  }
 0x29d PF: > { %p1480_p1 = scmp.ge.s32.totalorder %s1626_s15, 2  ;;  %s1394_s10 = sand.u32 1, %s1614_s12  }
 0x29e   : > { %s1395_s11 = scalar_lea.sflag [#allocation3], %s1394_s10 }
 0x29f   : > { %p1477_p2 = pnand %p1480_p1, %p1695_p6 }
 0x2a1   : > { %1609 = dma.done.wait (!%p1477_p2), %s1395_s11, 1024  }
 0x2a2   : > { %1611 = vsyncadd (!%p1477_p2), %s1395_s11, 4294966272  ;;  %p13_p3 = scmp.ge.s32.totalorder %s1678_s18, 4   ;;  %s2394_s12 = smov %s1618_s13 }
 0x2a3   : > { %s2395_s13 = smov %s1622_s14  ;;  %s2396_s14 = smov %s1689_s21 }
 0x2a4   : > { %s2397_s15 = smov %s1678_s18  ;;  %15 = sbr.rel (!%p13_p3) target bundleno = 3 (0x3), region = 75 }
 0x2ab   :  { %1400 = vsyncpa [#allocation3], 1 }
 0x2ac   :  { %1402 = vsyncpa [#allocation3 + $0x1], 1 }

</bundles_post_ra>
